<compile_context>
chip_gen: v5e
topology: v5e:2x2
jax: 0.10.0
libtpu: 0.0.40
codegen_flags: <defaults>
</compile_context>

<pallas_src>
import functools

import numpy as np
import jax
import jax.numpy as jnp
from jax import lax
from jax.experimental import pallas as pl
from jax.experimental.pallas import tpu as pltpu


_LAYERS = ("conv0", "conv1", "conv2", "conv3", "conv4", "conv5", "conv6", "convF")


# --------------------------- fused network kernel ---------------------------------------
def _fused_cnn_kernel(x_ref, w_ref, o_ref, patch_ref, *, H, W, C, apply_clamp):
    """Runs conv0..convF (tanh / residual / clamp fused) for ONE image.

    x_ref:     (1, C, H*W)   padded input, channel-major, spatial flattened (i*W+j)
    w_ref:     (8, C, 9*C)   per-layer weight matrices, column = (ky*3+kx)*C + ci
    o_ref:     (1, C, H*W)   convF output (channel 0 is the real output channel)
    patch_ref: (9*C, H*W)    VMEM im2col scratch, rebuilt for every layer
    """
    HW = H * W

    # Per-lane column index j of each flattened spatial position; used to patch up
    # the wrap-around column of the horizontal circular shifts.
    col = lax.broadcasted_iota(jnp.int32, (C, HW), 1) % W
    not_first_col = col > 0          # j-1 stays inside the row
    not_last_col = col < (W - 1)     # j+1 stays inside the row

    def conv(a, layer):
        # Tap t = ky*3+kx of the patch holds a[ci, (i+ky-1) mod H, (j+kx-1) mod W].
        for ky in range(3):
            dy = ky - 1
            # Vertical circular shift: a flat roll by dy*W is exact (wraps rows).
            v = a if dy == 0 else pltpu.roll(a, (-dy * W) % HW, 1)
            # Horizontal circular shift: flat roll by +-1; the column that would
            # wrap into the neighbouring row is taken from a second roll that
            # stays inside the row.
            left = jnp.where(not_first_col,
                             pltpu.roll(v, 1, 1),                    # v[p-1]
                             pltpu.roll(v, (HW - (W - 1)) % HW, 1))  # v[p+(W-1)]
            right = jnp.where(not_last_col,
                              pltpu.roll(v, HW - 1, 1),              # v[p+1]
                              pltpu.roll(v, W - 1, 1))               # v[p-(W-1)]
            for kx, s in enumerate((left, v, right)):                # kx=0,1,2 -> dx=-1,0,+1
                patch_ref[pl.ds((ky * 3 + kx) * C, C), :] = s
        # One lane-dense MXU matmul per layer: (C, 9C) @ (9C, HW) -> (C, HW).
        return jnp.dot(w_ref[layer], patch_ref[...],
                       preferred_element_type=jnp.float32)

    x = x_ref[0]                                  # (C, HW)
    residual = conv(x, 0)                         # conv0(x) (torch computes it twice)
    out = jnp.tanh(conv(residual, 1))             # conv1 -> tanh
    out = jnp.tanh(residual + conv(out, 2))       # conv2 -> +residual -> tanh
    residual = out
    out = jnp.tanh(conv(out, 3))                  # conv3 -> tanh
    out = jnp.tanh(residual + conv(out, 4))       # conv4 -> +residual -> tanh
    residual = out
    out = jnp.tanh(conv(out, 5))                  # conv5 -> tanh
    out = jnp.tanh(residual + conv(out, 6))       # conv6 -> +residual -> tanh
    y = conv(out, 7)                              # convF
    if apply_clamp:                               # ACNN clamp, fused in-kernel
        y = jnp.where(y >= 1.001, jnp.float32(1.001), y)
        y = jnp.where(y <= -1.001, jnp.float32(-1.001), y)
    o_ref[0] = y


# --------------------------- wrapper ----------------------------------------------------
def _pack_weight(w_oihw, C):
    """(Cout, Cin, 3, 3) -> (C, 9*C) with column index (ky*3+kx)*C + ci (zero-padded)."""
    co, ci = w_oihw.shape[:2]
    w = jnp.pad(w_oihw.astype(jnp.float32),
                ((0, C - co), (0, C - ci), (0, 0), (0, 0)))
    return jnp.transpose(w, (0, 2, 3, 1)).reshape(C, 9 * C)


def cnn_cn_forward(params, x_nchw, mode="ACNN"):
    mid = params["conv1"].shape[0]
    N, cin, H, W = x_nchw.shape
    HW = H * W
    C = ((max(mid, cin) + 7) // 8) * 8            # sublane-aligned channel width

    # NCHW with spatial flattened row-major == the (C, H*W) in-kernel layout.
    x = x_nchw.astype(jnp.float32).reshape(N, cin, HW)
    x = jnp.pad(x, ((0, 0), (0, C - cin), (0, 0)))                       # (N, C, HW)
    w_all = jnp.stack([_pack_weight(params[n], C) for n in _LAYERS])     # (8, C, 9C)

    kernel = functools.partial(_fused_cnn_kernel, H=H, W=W, C=C,
                               apply_clamp=(mode == "ACNN"))
    out = pl.pallas_call(
        kernel,
        out_shape=jax.ShapeDtypeStruct((N, C, HW), jnp.float32),
        grid=(N,),
        in_specs=[
            pl.BlockSpec((1, C, HW), lambda b: (b, 0, 0)),               # one image
            pl.BlockSpec((len(_LAYERS), C, 9 * C), lambda b: (0, 0, 0)),  # all weights (tiny)
        ],
        out_specs=pl.BlockSpec((1, C, HW), lambda b: (b, 0, 0)),
        scratch_shapes=[pltpu.VMEM((9 * C, HW), jnp.float32)],           # im2col scratch
        compiler_params=pltpu.CompilerParams(
            dimension_semantics=("parallel",)),                          # batch -> 2 TCs on v7x
    )(x, w_all)

    out = out[:, :1, :]                           # real output channel
    if mode == "mACNN":
        mass = jnp.mean(x_nchw.astype(jnp.float32), axis=(2, 3),
                        keepdims=True).reshape(N, 1, 1)
        out1 = jnp.mean(out, axis=2, keepdims=True) - mass
        out = out - out1
        out = jnp.where(out >= 1.1647, jnp.float32(1.1647), out)
        out = jnp.where(out <= -1.1647, jnp.float32(-1.1647), out)
    return out.reshape(N, 1, H, W)


# --------------------------- params -----------------------------------------------------
def init_params(mid_planes, key):
    ks = jax.random.split(key, 8)

    def w(k, cout, cin):
        fan_in = cin * 9
        return jax.random.normal(k, (cout, cin, 3, 3), jnp.float32) * np.sqrt(2.0 / fan_in)

    return {
        "conv0": w(ks[0], mid_planes, 1),
        "conv1": w(ks[1], mid_planes, mid_planes),
        "conv2": w(ks[2], mid_planes, mid_planes),
        "conv3": w(ks[3], mid_planes, mid_planes),
        "conv4": w(ks[4], mid_planes, mid_planes),
        "conv5": w(ks[5], mid_planes, mid_planes),
        "conv6": w(ks[6], mid_planes, mid_planes),
        "convF": w(ks[7], 1, mid_planes),
    }


# --------------------------- independent reference (XLA conv) ---------------------------
def _ref_conv(x, w):
    xp = jnp.pad(x, ((0, 0), (0, 0), (1, 1), (1, 1)), mode="wrap")   # circular pad=1
    return lax.conv_general_dilated(
        xp, w.astype(jnp.float32), window_strides=(1, 1), padding="VALID",
        dimension_numbers=("NCHW", "OIHW", "NCHW"),
        precision=lax.Precision.HIGHEST)


def ref_forward(params, x_nchw, mode="ACNN"):
    x = x_nchw.astype(jnp.float32)
    mass = jnp.mean(x, axis=(2, 3), keepdims=True)
    residual = _ref_conv(x, params["conv0"])
    out = residual
    out = jnp.tanh(_ref_conv(out, params["conv1"]))
    out = jnp.tanh(residual + _ref_conv(out, params["conv2"]))
    residual = out
    out = jnp.tanh(_ref_conv(out, params["conv3"]))
    out = jnp.tanh(residual + _ref_conv(out, params["conv4"]))
    residual = out
    out = jnp.tanh(_ref_conv(out, params["conv5"]))
    out = jnp.tanh(residual + _ref_conv(out, params["conv6"]))
    out = _ref_conv(out, params["convF"])
    if mode == "ACNN":
        out = jnp.where(out >= 1.001, 1.001, out)
        out = jnp.where(out <= -1.001, -1.001, out)
    else:
        out1 = jnp.mean(out, axis=(2, 3), keepdims=True) - mass
        out = out - out1
        out = jnp.where(out >= 1.1647, 1.1647, out)
        out = jnp.where(out <= -1.1647, -1.1647, out)
    return out


if __name__ == "__main__":
    mid_planes = 8
    key = jax.random.PRNGKey(0)
    kx_, kp = jax.random.split(key)
    x = jax.random.normal(kx_, (2, 1, 16, 16), jnp.float32)   # NCHW, Conv2d(1, mid_planes)
    params = init_params(mid_planes, kp)

    fwd = jax.jit(cnn_cn_forward, static_argnames=("mode",))

    out = jax.block_until_ready(fwd(params, x, mode="ACNN"))
    assert out.shape == (2, 1, 16, 16)
    ref = jax.block_until_ready(ref_forward(params, x, mode="ACNN"))
    np.testing.assert_allclose(np.asarray(out), np.asarray(ref), rtol=2e-3, atol=2e-3)

    out_m = jax.block_until_ready(fwd(params, x, mode="mACNN"))
    ref_m = jax.block_until_ready(ref_forward(params, x, mode="mACNN"))
    np.testing.assert_allclose(np.asarray(out_m), np.asarray(ref_m), rtol=2e-3, atol=2e-3)

    print("KERNEL_OK")
</pallas_src>

<mosaic_0001>
module attributes {stable_mosaic.version = 11 : i64} {
  func.func @_fused_cnn_kernel(%arg0: i32, %arg1: memref<1x8x256xf32, #tpu.memory_space<vmem>>, %arg2: memref<8x8x72xf32, #tpu.memory_space<vmem>>, %arg3: memref<1x8x256xf32, #tpu.memory_space<vmem>>, %arg4: memref<72x256xf32, #tpu.memory_space<vmem>>) attributes {dimension_semantics = [#tpu.dimension_semantics<parallel>], iteration_bounds = array<i64: 2>, scalar_prefetch = 0 : i64, scratch_operands = 1 : i64, tpu.core_type = #tpu.core_type<tc>, window_params = [{transform_indices = @transform_0, window_bounds = array<i64: 1, 8, 256>}, {pipeline_mode = #tpu.pipeline_mode<synchronous>, transform_indices = @transform_1, window_bounds = array<i64: 8, 8, 72>}, {transform_indices = @transform_2, window_bounds = array<i64: 1, 8, 256>}]} {
    %0 = tpu.iota {dimensions = array<i32: 1>} : vector<8x256xi32>
    %c16_i32 = arith.constant 16 : i32
    %c0_i32 = arith.constant 0 : i32
    %1 = arith.cmpi eq, %c16_i32, %c0_i32 : i32
    %c1_i32 = arith.constant 1 : i32
    %2 = arith.select %1, %c1_i32, %c16_i32 : i32
    %3 = vector.broadcast %2 : i32 to vector<8x256xi32>
    %4 = arith.remsi %0, %3 : vector<8x256xi32>
    %c0_i32_0 = arith.constant 0 : i32
    %5 = vector.broadcast %c0_i32_0 : i32 to vector<8x256xi32>
    %6 = arith.cmpi ne, %4, %5 : vector<8x256xi32>
    %c0_i32_1 = arith.constant 0 : i32
    %7 = vector.broadcast %c0_i32_1 : i32 to vector<8x256xi32>
    %8 = arith.cmpi slt, %4, %7 : vector<8x256xi32>
    %c0_i32_2 = arith.constant 0 : i32
    %9 = arith.cmpi slt, %2, %c0_i32_2 : i32
    %10 = vector.broadcast %9 : i1 to vector<8x256xi1>
    %11 = vector.broadcast %10 : vector<8x256xi1> to vector<8x256xi1>
    %12 = arith.xori %8, %11 : vector<8x256xi1>
    %13 = arith.andi %12, %6 : vector<8x256xi1>
    %14 = vector.broadcast %2 : i32 to vector<8x256xi32>
    %15 = arith.addi %4, %14 : vector<8x256xi32>
    %16 = arith.select %13, %15, %4 : vector<8x256xi1>, vector<8x256xi32>
    %c0_i32_3 = arith.constant 0 : i32
    %17 = vector.broadcast %c0_i32_3 : i32 to vector<8x256xi32>
    %18 = arith.cmpi sgt, %16, %17 : vector<8x256xi32>
    %c15_i32 = arith.constant 15 : i32
    %19 = vector.broadcast %c15_i32 : i32 to vector<8x256xi32>
    %20 = arith.cmpi slt, %16, %19 : vector<8x256xi32>
    %c0 = arith.constant 0 : index
    %c0_4 = arith.constant 0 : index
    %c0_5 = arith.constant 0 : index
    %21 = vector.load %arg1[%c0, %c0_4, %c0_5] : memref<1x8x256xf32, #tpu.memory_space<vmem>>, vector<1x8x256xf32>
    %22 = vector.shape_cast %21 : vector<1x8x256xf32> to vector<8x256xf32>
    %c16_i32_6 = arith.constant 16 : i32
    %23 = tpu.dynamic_rotate %22 by %c16_i32_6 dim 1 : vector<8x256xf32>, i32 -> vector<8x256xf32>
    %c1_i32_7 = arith.constant 1 : i32
    %24 = tpu.dynamic_rotate %23 by %c1_i32_7 dim 1 : vector<8x256xf32>, i32 -> vector<8x256xf32>
    %c241_i32 = arith.constant 241 : i32
    %25 = tpu.dynamic_rotate %23 by %c241_i32 dim 1 : vector<8x256xf32>, i32 -> vector<8x256xf32>
    %26 = arith.select %18, %24, %25 : vector<8x256xi1>, vector<8x256xf32>
    %c255_i32 = arith.constant 255 : i32
    %27 = tpu.dynamic_rotate %23 by %c255_i32 dim 1 : vector<8x256xf32>, i32 -> vector<8x256xf32>
    %c15_i32_8 = arith.constant 15 : i32
    %28 = tpu.dynamic_rotate %23 by %c15_i32_8 dim 1 : vector<8x256xf32>, i32 -> vector<8x256xf32>
    %29 = arith.select %20, %27, %28 : vector<8x256xi1>, vector<8x256xf32>
    %c0_9 = arith.constant 0 : index
    %c0_10 = arith.constant 0 : index
    %30 = vector.load %arg4[%c0_9, %c0_10] : memref<72x256xf32, #tpu.memory_space<vmem>>, vector<8x256xf32>
    tpu.vector_store %arg4[%c0_9, %c0_10], %26 {strides = array<i32>} : memref<72x256xf32, #tpu.memory_space<vmem>>, vector<8x256xf32>,
    %c8 = arith.constant 8 : index
    %c0_11 = arith.constant 0 : index
    %31 = vector.load %arg4[%c8, %c0_11] : memref<72x256xf32, #tpu.memory_space<vmem>>, vector<8x256xf32>
    tpu.vector_store %arg4[%c8, %c0_11], %23 {strides = array<i32>} : memref<72x256xf32, #tpu.memory_space<vmem>>, vector<8x256xf32>,
    %c16 = arith.constant 16 : index
    %c0_12 = arith.constant 0 : index
    %32 = vector.load %arg4[%c16, %c0_12] : memref<72x256xf32, #tpu.memory_space<vmem>>, vector<8x256xf32>
    tpu.vector_store %arg4[%c16, %c0_12], %29 {strides = array<i32>} : memref<72x256xf32, #tpu.memory_space<vmem>>, vector<8x256xf32>,
    %c1_i32_13 = arith.constant 1 : i32
    %33 = tpu.dynamic_rotate %22 by %c1_i32_13 dim 1 : vector<8x256xf32>, i32 -> vector<8x256xf32>
    %c241_i32_14 = arith.constant 241 : i32
    %34 = tpu.dynamic_rotate %22 by %c241_i32_14 dim 1 : vector<8x256xf32>, i32 -> vector<8x256xf32>
    %35 = arith.select %18, %33, %34 : vector<8x256xi1>, vector<8x256xf32>
    %c255_i32_15 = arith.constant 255 : i32
    %36 = tpu.dynamic_rotate %22 by %c255_i32_15 dim 1 : vector<8x256xf32>, i32 -> vector<8x256xf32>
    %c15_i32_16 = arith.constant 15 : i32
    %37 = tpu.dynamic_rotate %22 by %c15_i32_16 dim 1 : vector<8x256xf32>, i32 -> vector<8x256xf32>
    %38 = arith.select %20, %36, %37 : vector<8x256xi1>, vector<8x256xf32>
    %c24 = arith.constant 24 : index
    %c0_17 = arith.constant 0 : index
    %39 = vector.load %arg4[%c24, %c0_17] : memref<72x256xf32, #tpu.memory_space<vmem>>, vector<8x256xf32>
    tpu.vector_store %arg4[%c24, %c0_17], %35 {strides = array<i32>} : memref<72x256xf32, #tpu.memory_space<vmem>>, vector<8x256xf32>,
    %c32 = arith.constant 32 : index
    %c0_18 = arith.constant 0 : index
    %40 = vector.load %arg4[%c32, %c0_18] : memref<72x256xf32, #tpu.memory_space<vmem>>, vector<8x256xf32>
    tpu.vector_store %arg4[%c32, %c0_18], %22 {strides = array<i32>} : memref<72x256xf32, #tpu.memory_space<vmem>>, vector<8x256xf32>,
    %c40 = arith.constant 40 : index
    %c0_19 = arith.constant 0 : index
    %41 = vector.load %arg4[%c40, %c0_19] : memref<72x256xf32, #tpu.memory_space<vmem>>, vector<8x256xf32>
    tpu.vector_store %arg4[%c40, %c0_19], %38 {strides = array<i32>} : memref<72x256xf32, #tpu.memory_space<vmem>>, vector<8x256xf32>,
    %c240_i32 = arith.constant 240 : i32
    %42 = tpu.dynamic_rotate %22 by %c240_i32 dim 1 : vector<8x256xf32>, i32 -> vector<8x256xf32>
    %c1_i32_20 = arith.constant 1 : i32
    %43 = tpu.dynamic_rotate %42 by %c1_i32_20 dim 1 : vector<8x256xf32>, i32 -> vector<8x256xf32>
    %c241_i32_21 = arith.constant 241 : i32
    %44 = tpu.dynamic_rotate %42 by %c241_i32_21 dim 1 : vector<8x256xf32>, i32 -> vector<8x256xf32>
    %45 = arith.select %18, %43, %44 : vector<8x256xi1>, vector<8x256xf32>
    %c255_i32_22 = arith.constant 255 : i32
    %46 = tpu.dynamic_rotate %42 by %c255_i32_22 dim 1 : vector<8x256xf32>, i32 -> vector<8x256xf32>
    %c15_i32_23 = arith.constant 15 : i32
    %47 = tpu.dynamic_rotate %42 by %c15_i32_23 dim 1 : vector<8x256xf32>, i32 -> vector<8x256xf32>
    %48 = arith.select %20, %46, %47 : vector<8x256xi1>, vector<8x256xf32>
    %c48 = arith.constant 48 : index
    %c0_24 = arith.constant 0 : index
    %49 = vector.load %arg4[%c48, %c0_24] : memref<72x256xf32, #tpu.memory_space<vmem>>, vector<8x256xf32>
    tpu.vector_store %arg4[%c48, %c0_24], %45 {strides = array<i32>} : memref<72x256xf32, #tpu.memory_space<vmem>>, vector<8x256xf32>,
    %c56 = arith.constant 56 : index
    %c0_25 = arith.constant 0 : index
    %50 = vector.load %arg4[%c56, %c0_25] : memref<72x256xf32, #tpu.memory_space<vmem>>, vector<8x256xf32>
    tpu.vector_store %arg4[%c56, %c0_25], %42 {strides = array<i32>} : memref<72x256xf32, #tpu.memory_space<vmem>>, vector<8x256xf32>,
    %c64 = arith.constant 64 : index
    %c0_26 = arith.constant 0 : index
    %51 = vector.load %arg4[%c64, %c0_26] : memref<72x256xf32, #tpu.memory_space<vmem>>, vector<8x256xf32>
    tpu.vector_store %arg4[%c64, %c0_26], %48 {strides = array<i32>} : memref<72x256xf32, #tpu.memory_space<vmem>>, vector<8x256xf32>,
    %c0_27 = arith.constant 0 : index
    %c0_28 = arith.constant 0 : index
    %c0_29 = arith.constant 0 : index
    %52 = vector.load %arg2[%c0_27, %c0_28, %c0_29] : memref<8x8x72xf32, #tpu.memory_space<vmem>>, vector<1x8x72xf32>
    %53 = vector.shape_cast %52 : vector<1x8x72xf32> to vector<8x72xf32>
    %c0_30 = arith.constant 0 : index
    %c0_31 = arith.constant 0 : index
    %54 = vector.load %arg4[%c0_30, %c0_31] : memref<72x256xf32, #tpu.memory_space<vmem>>, vector<72x256xf32>
    %cst = arith.constant dense<0.000000e+00> : vector<8x256xf32>
    %55 = tpu.matmul %53, %54, %cst {dimension_numbers = #tpu.dot_dimension_numbers<[1], [0], [0], [1], [0, 0, 1, 1], [], []>} : vector<8x72xf32>, vector<72x256xf32>, vector<8x256xf32> -> vector<8x256xf32>
    %c16_i32_32 = arith.constant 16 : i32
    %56 = tpu.dynamic_rotate %55 by %c16_i32_32 dim 1 : vector<8x256xf32>, i32 -> vector<8x256xf32>
    %c1_i32_33 = arith.constant 1 : i32
    %57 = tpu.dynamic_rotate %56 by %c1_i32_33 dim 1 : vector<8x256xf32>, i32 -> vector<8x256xf32>
    %c241_i32_34 = arith.constant 241 : i32
    %58 = tpu.dynamic_rotate %56 by %c241_i32_34 dim 1 : vector<8x256xf32>, i32 -> vector<8x256xf32>
    %59 = arith.select %18, %57, %58 : vector<8x256xi1>, vector<8x256xf32>
    %c255_i32_35 = arith.constant 255 : i32
    %60 = tpu.dynamic_rotate %56 by %c255_i32_35 dim 1 : vector<8x256xf32>, i32 -> vector<8x256xf32>
    %c15_i32_36 = arith.constant 15 : i32
    %61 = tpu.dynamic_rotate %56 by %c15_i32_36 dim 1 : vector<8x256xf32>, i32 -> vector<8x256xf32>
    %62 = arith.select %20, %60, %61 : vector<8x256xi1>, vector<8x256xf32>
    %c0_37 = arith.constant 0 : index
    %c0_38 = arith.constant 0 : index
    %63 = vector.load %arg4[%c0_37, %c0_38] : memref<72x256xf32, #tpu.memory_space<vmem>>, vector<8x256xf32>
    tpu.vector_store %arg4[%c0_37, %c0_38], %59 {strides = array<i32>} : memref<72x256xf32, #tpu.memory_space<vmem>>, vector<8x256xf32>,
    %c8_39 = arith.constant 8 : index
    %c0_40 = arith.constant 0 : index
    %64 = vector.load %arg4[%c8_39, %c0_40] : memref<72x256xf32, #tpu.memory_space<vmem>>, vector<8x256xf32>
    tpu.vector_store %arg4[%c8_39, %c0_40], %56 {strides = array<i32>} : memref<72x256xf32, #tpu.memory_space<vmem>>, vector<8x256xf32>,
    %c16_41 = arith.constant 16 : index
    %c0_42 = arith.constant 0 : index
    %65 = vector.load %arg4[%c16_41, %c0_42] : memref<72x256xf32, #tpu.memory_space<vmem>>, vector<8x256xf32>
    tpu.vector_store %arg4[%c16_41, %c0_42], %62 {strides = array<i32>} : memref<72x256xf32, #tpu.memory_space<vmem>>, vector<8x256xf32>,
    %c1_i32_43 = arith.constant 1 : i32
    %66 = tpu.dynamic_rotate %55 by %c1_i32_43 dim 1 : vector<8x256xf32>, i32 -> vector<8x256xf32>
    %c241_i32_44 = arith.constant 241 : i32
    %67 = tpu.dynamic_rotate %55 by %c241_i32_44 dim 1 : vector<8x256xf32>, i32 -> vector<8x256xf32>
    %68 = arith.select %18, %66, %67 : vector<8x256xi1>, vector<8x256xf32>
    %c255_i32_45 = arith.constant 255 : i32
    %69 = tpu.dynamic_rotate %55 by %c255_i32_45 dim 1 : vector<8x256xf32>, i32 -> vector<8x256xf32>
    %c15_i32_46 = arith.constant 15 : i32
    %70 = tpu.dynamic_rotate %55 by %c15_i32_46 dim 1 : vector<8x256xf32>, i32 -> vector<8x256xf32>
    %71 = arith.select %20, %69, %70 : vector<8x256xi1>, vector<8x256xf32>
    %c24_47 = arith.constant 24 : index
    %c0_48 = arith.constant 0 : index
    %72 = vector.load %arg4[%c24_47, %c0_48] : memref<72x256xf32, #tpu.memory_space<vmem>>, vector<8x256xf32>
    tpu.vector_store %arg4[%c24_47, %c0_48], %68 {strides = array<i32>} : memref<72x256xf32, #tpu.memory_space<vmem>>, vector<8x256xf32>,
    %c32_49 = arith.constant 32 : index
    %c0_50 = arith.constant 0 : index
    %73 = vector.load %arg4[%c32_49, %c0_50] : memref<72x256xf32, #tpu.memory_space<vmem>>, vector<8x256xf32>
    tpu.vector_store %arg4[%c32_49, %c0_50], %55 {strides = array<i32>} : memref<72x256xf32, #tpu.memory_space<vmem>>, vector<8x256xf32>,
    %c40_51 = arith.constant 40 : index
    %c0_52 = arith.constant 0 : index
    %74 = vector.load %arg4[%c40_51, %c0_52] : memref<72x256xf32, #tpu.memory_space<vmem>>, vector<8x256xf32>
    tpu.vector_store %arg4[%c40_51, %c0_52], %71 {strides = array<i32>} : memref<72x256xf32, #tpu.memory_space<vmem>>, vector<8x256xf32>,
    %c240_i32_53 = arith.constant 240 : i32
    %75 = tpu.dynamic_rotate %55 by %c240_i32_53 dim 1 : vector<8x256xf32>, i32 -> vector<8x256xf32>
    %c1_i32_54 = arith.constant 1 : i32
    %76 = tpu.dynamic_rotate %75 by %c1_i32_54 dim 1 : vector<8x256xf32>, i32 -> vector<8x256xf32>
    %c241_i32_55 = arith.constant 241 : i32
    %77 = tpu.dynamic_rotate %75 by %c241_i32_55 dim 1 : vector<8x256xf32>, i32 -> vector<8x256xf32>
    %78 = arith.select %18, %76, %77 : vector<8x256xi1>, vector<8x256xf32>
    %c255_i32_56 = arith.constant 255 : i32
    %79 = tpu.dynamic_rotate %75 by %c255_i32_56 dim 1 : vector<8x256xf32>, i32 -> vector<8x256xf32>
    %c15_i32_57 = arith.constant 15 : i32
    %80 = tpu.dynamic_rotate %75 by %c15_i32_57 dim 1 : vector<8x256xf32>, i32 -> vector<8x256xf32>
    %81 = arith.select %20, %79, %80 : vector<8x256xi1>, vector<8x256xf32>
    %c48_58 = arith.constant 48 : index
    %c0_59 = arith.constant 0 : index
    %82 = vector.load %arg4[%c48_58, %c0_59] : memref<72x256xf32, #tpu.memory_space<vmem>>, vector<8x256xf32>
    tpu.vector_store %arg4[%c48_58, %c0_59], %78 {strides = array<i32>} : memref<72x256xf32, #tpu.memory_space<vmem>>, vector<8x256xf32>,
    %c56_60 = arith.constant 56 : index
    %c0_61 = arith.constant 0 : index
    %83 = vector.load %arg4[%c56_60, %c0_61] : memref<72x256xf32, #tpu.memory_space<vmem>>, vector<8x256xf32>
    tpu.vector_store %arg4[%c56_60, %c0_61], %75 {strides = array<i32>} : memref<72x256xf32, #tpu.memory_space<vmem>>, vector<8x256xf32>,
    %c64_62 = arith.constant 64 : index
    %c0_63 = arith.constant 0 : index
    %84 = vector.load %arg4[%c64_62, %c0_63] : memref<72x256xf32, #tpu.memory_space<vmem>>, vector<8x256xf32>
    tpu.vector_store %arg4[%c64_62, %c0_63], %81 {strides = array<i32>} : memref<72x256xf32, #tpu.memory_space<vmem>>, vector<8x256xf32>,
    %c1 = arith.constant 1 : index
    %c0_64 = arith.constant 0 : index
    %c0_65 = arith.constant 0 : index
    %85 = vector.load %arg2[%c1, %c0_64, %c0_65] : memref<8x8x72xf32, #tpu.memory_space<vmem>>, vector<1x8x72xf32>
    %86 = vector.shape_cast %85 : vector<1x8x72xf32> to vector<8x72xf32>
    %c0_66 = arith.constant 0 : index
    %c0_67 = arith.constant 0 : index
    %87 = vector.load %arg4[%c0_66, %c0_67] : memref<72x256xf32, #tpu.memory_space<vmem>>, vector<72x256xf32>
    %cst_68 = arith.constant dense<0.000000e+00> : vector<8x256xf32>
    %88 = tpu.matmul %86, %87, %cst_68 {dimension_numbers = #tpu.dot_dimension_numbers<[1], [0], [0], [1], [0, 0, 1, 1], [], []>} : vector<8x72xf32>, vector<72x256xf32>, vector<8x256xf32> -> vector<8x256xf32>
    %89 = math.tanh %88 : vector<8x256xf32>
    %c16_i32_69 = arith.constant 16 : i32
    %90 = tpu.dynamic_rotate %89 by %c16_i32_69 dim 1 : vector<8x256xf32>, i32 -> vector<8x256xf32>
    %c1_i32_70 = arith.constant 1 : i32
    %91 = tpu.dynamic_rotate %90 by %c1_i32_70 dim 1 : vector<8x256xf32>, i32 -> vector<8x256xf32>
    %c241_i32_71 = arith.constant 241 : i32
    %92 = tpu.dynamic_rotate %90 by %c241_i32_71 dim 1 : vector<8x256xf32>, i32 -> vector<8x256xf32>
    %93 = arith.select %18, %91, %92 : vector<8x256xi1>, vector<8x256xf32>
    %c255_i32_72 = arith.constant 255 : i32
    %94 = tpu.dynamic_rotate %90 by %c255_i32_72 dim 1 : vector<8x256xf32>, i32 -> vector<8x256xf32>
    %c15_i32_73 = arith.constant 15 : i32
    %95 = tpu.dynamic_rotate %90 by %c15_i32_73 dim 1 : vector<8x256xf32>, i32 -> vector<8x256xf32>
    %96 = arith.select %20, %94, %95 : vector<8x256xi1>, vector<8x256xf32>
    %c0_74 = arith.constant 0 : index
    %c0_75 = arith.constant 0 : index
    %97 = vector.load %arg4[%c0_74, %c0_75] : memref<72x256xf32, #tpu.memory_space<vmem>>, vector<8x256xf32>
    tpu.vector_store %arg4[%c0_74, %c0_75], %93 {strides = array<i32>} : memref<72x256xf32, #tpu.memory_space<vmem>>, vector<8x256xf32>,
    %c8_76 = arith.constant 8 : index
    %c0_77 = arith.constant 0 : index
    %98 = vector.load %arg4[%c8_76, %c0_77] : memref<72x256xf32, #tpu.memory_space<vmem>>, vector<8x256xf32>
    tpu.vector_store %arg4[%c8_76, %c0_77], %90 {strides = array<i32>} : memref<72x256xf32, #tpu.memory_space<vmem>>, vector<8x256xf32>,
    %c16_78 = arith.constant 16 : index
    %c0_79 = arith.constant 0 : index
    %99 = vector.load %arg4[%c16_78, %c0_79] : memref<72x256xf32, #tpu.memory_space<vmem>>, vector<8x256xf32>
    tpu.vector_store %arg4[%c16_78, %c0_79], %96 {strides = array<i32>} : memref<72x256xf32, #tpu.memory_space<vmem>>, vector<8x256xf32>,
    %c1_i32_80 = arith.constant 1 : i32
    %100 = tpu.dynamic_rotate %89 by %c1_i32_80 dim 1 : vector<8x256xf32>, i32 -> vector<8x256xf32>
    %c241_i32_81 = arith.constant 241 : i32
    %101 = tpu.dynamic_rotate %89 by %c241_i32_81 dim 1 : vector<8x256xf32>, i32 -> vector<8x256xf32>
    %102 = arith.select %18, %100, %101 : vector<8x256xi1>, vector<8x256xf32>
    %c255_i32_82 = arith.constant 255 : i32
    %103 = tpu.dynamic_rotate %89 by %c255_i32_82 dim 1 : vector<8x256xf32>, i32 -> vector<8x256xf32>
    %c15_i32_83 = arith.constant 15 : i32
    %104 = tpu.dynamic_rotate %89 by %c15_i32_83 dim 1 : vector<8x256xf32>, i32 -> vector<8x256xf32>
    %105 = arith.select %20, %103, %104 : vector<8x256xi1>, vector<8x256xf32>
    %c24_84 = arith.constant 24 : index
    %c0_85 = arith.constant 0 : index
    %106 = vector.load %arg4[%c24_84, %c0_85] : memref<72x256xf32, #tpu.memory_space<vmem>>, vector<8x256xf32>
    tpu.vector_store %arg4[%c24_84, %c0_85], %102 {strides = array<i32>} : memref<72x256xf32, #tpu.memory_space<vmem>>, vector<8x256xf32>,
    %c32_86 = arith.constant 32 : index
    %c0_87 = arith.constant 0 : index
    %107 = vector.load %arg4[%c32_86, %c0_87] : memref<72x256xf32, #tpu.memory_space<vmem>>, vector<8x256xf32>
    tpu.vector_store %arg4[%c32_86, %c0_87], %89 {strides = array<i32>} : memref<72x256xf32, #tpu.memory_space<vmem>>, vector<8x256xf32>,
    %c40_88 = arith.constant 40 : index
    %c0_89 = arith.constant 0 : index
    %108 = vector.load %arg4[%c40_88, %c0_89] : memref<72x256xf32, #tpu.memory_space<vmem>>, vector<8x256xf32>
    tpu.vector_store %arg4[%c40_88, %c0_89], %105 {strides = array<i32>} : memref<72x256xf32, #tpu.memory_space<vmem>>, vector<8x256xf32>,
    %c240_i32_90 = arith.constant 240 : i32
    %109 = tpu.dynamic_rotate %89 by %c240_i32_90 dim 1 : vector<8x256xf32>, i32 -> vector<8x256xf32>
    %c1_i32_91 = arith.constant 1 : i32
    %110 = tpu.dynamic_rotate %109 by %c1_i32_91 dim 1 : vector<8x256xf32>, i32 -> vector<8x256xf32>
    %c241_i32_92 = arith.constant 241 : i32
    %111 = tpu.dynamic_rotate %109 by %c241_i32_92 dim 1 : vector<8x256xf32>, i32 -> vector<8x256xf32>
    %112 = arith.select %18, %110, %111 : vector<8x256xi1>, vector<8x256xf32>
    %c255_i32_93 = arith.constant 255 : i32
    %113 = tpu.dynamic_rotate %109 by %c255_i32_93 dim 1 : vector<8x256xf32>, i32 -> vector<8x256xf32>
    %c15_i32_94 = arith.constant 15 : i32
    %114 = tpu.dynamic_rotate %109 by %c15_i32_94 dim 1 : vector<8x256xf32>, i32 -> vector<8x256xf32>
    %115 = arith.select %20, %113, %114 : vector<8x256xi1>, vector<8x256xf32>
    %c48_95 = arith.constant 48 : index
    %c0_96 = arith.constant 0 : index
    %116 = vector.load %arg4[%c48_95, %c0_96] : memref<72x256xf32, #tpu.memory_space<vmem>>, vector<8x256xf32>
    tpu.vector_store %arg4[%c48_95, %c0_96], %112 {strides = array<i32>} : memref<72x256xf32, #tpu.memory_space<vmem>>, vector<8x256xf32>,
    %c56_97 = arith.constant 56 : index
    %c0_98 = arith.constant 0 : index
    %117 = vector.load %arg4[%c56_97, %c0_98] : memref<72x256xf32, #tpu.memory_space<vmem>>, vector<8x256xf32>
    tpu.vector_store %arg4[%c56_97, %c0_98], %109 {strides = array<i32>} : memref<72x256xf32, #tpu.memory_space<vmem>>, vector<8x256xf32>,
    %c64_99 = arith.constant 64 : index
    %c0_100 = arith.constant 0 : index
    %118 = vector.load %arg4[%c64_99, %c0_100] : memref<72x256xf32, #tpu.memory_space<vmem>>, vector<8x256xf32>
    tpu.vector_store %arg4[%c64_99, %c0_100], %115 {strides = array<i32>} : memref<72x256xf32, #tpu.memory_space<vmem>>, vector<8x256xf32>,
    %c2 = arith.constant 2 : index
    %c0_101 = arith.constant 0 : index
    %c0_102 = arith.constant 0 : index
    %119 = vector.load %arg2[%c2, %c0_101, %c0_102] : memref<8x8x72xf32, #tpu.memory_space<vmem>>, vector<1x8x72xf32>
    %120 = vector.shape_cast %119 : vector<1x8x72xf32> to vector<8x72xf32>
    %c0_103 = arith.constant 0 : index
    %c0_104 = arith.constant 0 : index
    %121 = vector.load %arg4[%c0_103, %c0_104] : memref<72x256xf32, #tpu.memory_space<vmem>>, vector<72x256xf32>
    %cst_105 = arith.constant dense<0.000000e+00> : vector<8x256xf32>
    %122 = tpu.matmul %120, %121, %cst_105 {dimension_numbers = #tpu.dot_dimension_numbers<[1], [0], [0], [1], [0, 0, 1, 1], [], []>} : vector<8x72xf32>, vector<72x256xf32>, vector<8x256xf32> -> vector<8x256xf32>
    %123 = arith.addf %55, %122 : vector<8x256xf32>
    %124 = math.tanh %123 : vector<8x256xf32>
    %c16_i32_106 = arith.constant 16 : i32
    %125 = tpu.dynamic_rotate %124 by %c16_i32_106 dim 1 : vector<8x256xf32>, i32 -> vector<8x256xf32>
    %c1_i32_107 = arith.constant 1 : i32
    %126 = tpu.dynamic_rotate %125 by %c1_i32_107 dim 1 : vector<8x256xf32>, i32 -> vector<8x256xf32>
    %c241_i32_108 = arith.constant 241 : i32
    %127 = tpu.dynamic_rotate %125 by %c241_i32_108 dim 1 : vector<8x256xf32>, i32 -> vector<8x256xf32>
    %128 = arith.select %18, %126, %127 : vector<8x256xi1>, vector<8x256xf32>
    %c255_i32_109 = arith.constant 255 : i32
    %129 = tpu.dynamic_rotate %125 by %c255_i32_109 dim 1 : vector<8x256xf32>, i32 -> vector<8x256xf32>
    %c15_i32_110 = arith.constant 15 : i32
    %130 = tpu.dynamic_rotate %125 by %c15_i32_110 dim 1 : vector<8x256xf32>, i32 -> vector<8x256xf32>
    %131 = arith.select %20, %129, %130 : vector<8x256xi1>, vector<8x256xf32>
    %c0_111 = arith.constant 0 : index
    %c0_112 = arith.constant 0 : index
    %132 = vector.load %arg4[%c0_111, %c0_112] : memref<72x256xf32, #tpu.memory_space<vmem>>, vector<8x256xf32>
    tpu.vector_store %arg4[%c0_111, %c0_112], %128 {strides = array<i32>} : memref<72x256xf32, #tpu.memory_space<vmem>>, vector<8x256xf32>,
    %c8_113 = arith.constant 8 : index
    %c0_114 = arith.constant 0 : index
    %133 = vector.load %arg4[%c8_113, %c0_114] : memref<72x256xf32, #tpu.memory_space<vmem>>, vector<8x256xf32>
    tpu.vector_store %arg4[%c8_113, %c0_114], %125 {strides = array<i32>} : memref<72x256xf32, #tpu.memory_space<vmem>>, vector<8x256xf32>,
    %c16_115 = arith.constant 16 : index
    %c0_116 = arith.constant 0 : index
    %134 = vector.load %arg4[%c16_115, %c0_116] : memref<72x256xf32, #tpu.memory_space<vmem>>, vector<8x256xf32>
    tpu.vector_store %arg4[%c16_115, %c0_116], %131 {strides = array<i32>} : memref<72x256xf32, #tpu.memory_space<vmem>>, vector<8x256xf32>,
    %c1_i32_117 = arith.constant 1 : i32
    %135 = tpu.dynamic_rotate %124 by %c1_i32_117 dim 1 : vector<8x256xf32>, i32 -> vector<8x256xf32>
    %c241_i32_118 = arith.constant 241 : i32
    %136 = tpu.dynamic_rotate %124 by %c241_i32_118 dim 1 : vector<8x256xf32>, i32 -> vector<8x256xf32>
    %137 = arith.select %18, %135, %136 : vector<8x256xi1>, vector<8x256xf32>
    %c255_i32_119 = arith.constant 255 : i32
    %138 = tpu.dynamic_rotate %124 by %c255_i32_119 dim 1 : vector<8x256xf32>, i32 -> vector<8x256xf32>
    %c15_i32_120 = arith.constant 15 : i32
    %139 = tpu.dynamic_rotate %124 by %c15_i32_120 dim 1 : vector<8x256xf32>, i32 -> vector<8x256xf32>
    %140 = arith.select %20, %138, %139 : vector<8x256xi1>, vector<8x256xf32>
    %c24_121 = arith.constant 24 : index
    %c0_122 = arith.constant 0 : index
    %141 = vector.load %arg4[%c24_121, %c0_122] : memref<72x256xf32, #tpu.memory_space<vmem>>, vector<8x256xf32>
    tpu.vector_store %arg4[%c24_121, %c0_122], %137 {strides = array<i32>} : memref<72x256xf32, #tpu.memory_space<vmem>>, vector<8x256xf32>,
    %c32_123 = arith.constant 32 : index
    %c0_124 = arith.constant 0 : index
    %142 = vector.load %arg4[%c32_123, %c0_124] : memref<72x256xf32, #tpu.memory_space<vmem>>, vector<8x256xf32>
    tpu.vector_store %arg4[%c32_123, %c0_124], %124 {strides = array<i32>} : memref<72x256xf32, #tpu.memory_space<vmem>>, vector<8x256xf32>,
    %c40_125 = arith.constant 40 : index
    %c0_126 = arith.constant 0 : index
    %143 = vector.load %arg4[%c40_125, %c0_126] : memref<72x256xf32, #tpu.memory_space<vmem>>, vector<8x256xf32>
    tpu.vector_store %arg4[%c40_125, %c0_126], %140 {strides = array<i32>} : memref<72x256xf32, #tpu.memory_space<vmem>>, vector<8x256xf32>,
    %c240_i32_127 = arith.constant 240 : i32
    %144 = tpu.dynamic_rotate %124 by %c240_i32_127 dim 1 : vector<8x256xf32>, i32 -> vector<8x256xf32>
    %c1_i32_128 = arith.constant 1 : i32
    %145 = tpu.dynamic_rotate %144 by %c1_i32_128 dim 1 : vector<8x256xf32>, i32 -> vector<8x256xf32>
    %c241_i32_129 = arith.constant 241 : i32
    %146 = tpu.dynamic_rotate %144 by %c241_i32_129 dim 1 : vector<8x256xf32>, i32 -> vector<8x256xf32>
    %147 = arith.select %18, %145, %146 : vector<8x256xi1>, vector<8x256xf32>
    %c255_i32_130 = arith.constant 255 : i32
    %148 = tpu.dynamic_rotate %144 by %c255_i32_130 dim 1 : vector<8x256xf32>, i32 -> vector<8x256xf32>
    %c15_i32_131 = arith.constant 15 : i32
    %149 = tpu.dynamic_rotate %144 by %c15_i32_131 dim 1 : vector<8x256xf32>, i32 -> vector<8x256xf32>
    %150 = arith.select %20, %148, %149 : vector<8x256xi1>, vector<8x256xf32>
    %c48_132 = arith.constant 48 : index
    %c0_133 = arith.constant 0 : index
    %151 = vector.load %arg4[%c48_132, %c0_133] : memref<72x256xf32, #tpu.memory_space<vmem>>, vector<8x256xf32>
    tpu.vector_store %arg4[%c48_132, %c0_133], %147 {strides = array<i32>} : memref<72x256xf32, #tpu.memory_space<vmem>>, vector<8x256xf32>,
    %c56_134 = arith.constant 56 : index
    %c0_135 = arith.constant 0 : index
    %152 = vector.load %arg4[%c56_134, %c0_135] : memref<72x256xf32, #tpu.memory_space<vmem>>, vector<8x256xf32>
    tpu.vector_store %arg4[%c56_134, %c0_135], %144 {strides = array<i32>} : memref<72x256xf32, #tpu.memory_space<vmem>>, vector<8x256xf32>,
    %c64_136 = arith.constant 64 : index
    %c0_137 = arith.constant 0 : index
    %153 = vector.load %arg4[%c64_136, %c0_137] : memref<72x256xf32, #tpu.memory_space<vmem>>, vector<8x256xf32>
    tpu.vector_store %arg4[%c64_136, %c0_137], %150 {strides = array<i32>} : memref<72x256xf32, #tpu.memory_space<vmem>>, vector<8x256xf32>,
    %c3 = arith.constant 3 : index
    %c0_138 = arith.constant 0 : index
    %c0_139 = arith.constant 0 : index
    %154 = vector.load %arg2[%c3, %c0_138, %c0_139] : memref<8x8x72xf32, #tpu.memory_space<vmem>>, vector<1x8x72xf32>
    %155 = vector.shape_cast %154 : vector<1x8x72xf32> to vector<8x72xf32>
    %c0_140 = arith.constant 0 : index
    %c0_141 = arith.constant 0 : index
    %156 = vector.load %arg4[%c0_140, %c0_141] : memref<72x256xf32, #tpu.memory_space<vmem>>, vector<72x256xf32>
    %cst_142 = arith.constant dense<0.000000e+00> : vector<8x256xf32>
    %157 = tpu.matmul %155, %156, %cst_142 {dimension_numbers = #tpu.dot_dimension_numbers<[1], [0], [0], [1], [0, 0, 1, 1], [], []>} : vector<8x72xf32>, vector<72x256xf32>, vector<8x256xf32> -> vector<8x256xf32>
    %158 = math.tanh %157 : vector<8x256xf32>
    %c16_i32_143 = arith.constant 16 : i32
    %159 = tpu.dynamic_rotate %158 by %c16_i32_143 dim 1 : vector<8x256xf32>, i32 -> vector<8x256xf32>
    %c1_i32_144 = arith.constant 1 : i32
    %160 = tpu.dynamic_rotate %159 by %c1_i32_144 dim 1 : vector<8x256xf32>, i32 -> vector<8x256xf32>
    %c241_i32_145 = arith.constant 241 : i32
    %161 = tpu.dynamic_rotate %159 by %c241_i32_145 dim 1 : vector<8x256xf32>, i32 -> vector<8x256xf32>
    %162 = arith.select %18, %160, %161 : vector<8x256xi1>, vector<8x256xf32>
    %c255_i32_146 = arith.constant 255 : i32
    %163 = tpu.dynamic_rotate %159 by %c255_i32_146 dim 1 : vector<8x256xf32>, i32 -> vector<8x256xf32>
    %c15_i32_147 = arith.constant 15 : i32
    %164 = tpu.dynamic_rotate %159 by %c15_i32_147 dim 1 : vector<8x256xf32>, i32 -> vector<8x256xf32>
    %165 = arith.select %20, %163, %164 : vector<8x256xi1>, vector<8x256xf32>
    %c0_148 = arith.constant 0 : index
    %c0_149 = arith.constant 0 : index
    %166 = vector.load %arg4[%c0_148, %c0_149] : memref<72x256xf32, #tpu.memory_space<vmem>>, vector<8x256xf32>
    tpu.vector_store %arg4[%c0_148, %c0_149], %162 {strides = array<i32>} : memref<72x256xf32, #tpu.memory_space<vmem>>, vector<8x256xf32>,
    %c8_150 = arith.constant 8 : index
    %c0_151 = arith.constant 0 : index
    %167 = vector.load %arg4[%c8_150, %c0_151] : memref<72x256xf32, #tpu.memory_space<vmem>>, vector<8x256xf32>
    tpu.vector_store %arg4[%c8_150, %c0_151], %159 {strides = array<i32>} : memref<72x256xf32, #tpu.memory_space<vmem>>, vector<8x256xf32>,
    %c16_152 = arith.constant 16 : index
    %c0_153 = arith.constant 0 : index
    %168 = vector.load %arg4[%c16_152, %c0_153] : memref<72x256xf32, #tpu.memory_space<vmem>>, vector<8x256xf32>
    tpu.vector_store %arg4[%c16_152, %c0_153], %165 {strides = array<i32>} : memref<72x256xf32, #tpu.memory_space<vmem>>, vector<8x256xf32>,
    %c1_i32_154 = arith.constant 1 : i32
    %169 = tpu.dynamic_rotate %158 by %c1_i32_154 dim 1 : vector<8x256xf32>, i32 -> vector<8x256xf32>
    %c241_i32_155 = arith.constant 241 : i32
    %170 = tpu.dynamic_rotate %158 by %c241_i32_155 dim 1 : vector<8x256xf32>, i32 -> vector<8x256xf32>
    %171 = arith.select %18, %169, %170 : vector<8x256xi1>, vector<8x256xf32>
    %c255_i32_156 = arith.constant 255 : i32
    %172 = tpu.dynamic_rotate %158 by %c255_i32_156 dim 1 : vector<8x256xf32>, i32 -> vector<8x256xf32>
    %c15_i32_157 = arith.constant 15 : i32
    %173 = tpu.dynamic_rotate %158 by %c15_i32_157 dim 1 : vector<8x256xf32>, i32 -> vector<8x256xf32>
    %174 = arith.select %20, %172, %173 : vector<8x256xi1>, vector<8x256xf32>
    %c24_158 = arith.constant 24 : index
    %c0_159 = arith.constant 0 : index
    %175 = vector.load %arg4[%c24_158, %c0_159] : memref<72x256xf32, #tpu.memory_space<vmem>>, vector<8x256xf32>
    tpu.vector_store %arg4[%c24_158, %c0_159], %171 {strides = array<i32>} : memref<72x256xf32, #tpu.memory_space<vmem>>, vector<8x256xf32>,
    %c32_160 = arith.constant 32 : index
    %c0_161 = arith.constant 0 : index
    %176 = vector.load %arg4[%c32_160, %c0_161] : memref<72x256xf32, #tpu.memory_space<vmem>>, vector<8x256xf32>
    tpu.vector_store %arg4[%c32_160, %c0_161], %158 {strides = array<i32>} : memref<72x256xf32, #tpu.memory_space<vmem>>, vector<8x256xf32>,
    %c40_162 = arith.constant 40 : index
    %c0_163 = arith.constant 0 : index
    %177 = vector.load %arg4[%c40_162, %c0_163] : memref<72x256xf32, #tpu.memory_space<vmem>>, vector<8x256xf32>
    tpu.vector_store %arg4[%c40_162, %c0_163], %174 {strides = array<i32>} : memref<72x256xf32, #tpu.memory_space<vmem>>, vector<8x256xf32>,
    %c240_i32_164 = arith.constant 240 : i32
    %178 = tpu.dynamic_rotate %158 by %c240_i32_164 dim 1 : vector<8x256xf32>, i32 -> vector<8x256xf32>
    %c1_i32_165 = arith.constant 1 : i32
    %179 = tpu.dynamic_rotate %178 by %c1_i32_165 dim 1 : vector<8x256xf32>, i32 -> vector<8x256xf32>
    %c241_i32_166 = arith.constant 241 : i32
    %180 = tpu.dynamic_rotate %178 by %c241_i32_166 dim 1 : vector<8x256xf32>, i32 -> vector<8x256xf32>
    %181 = arith.select %18, %179, %180 : vector<8x256xi1>, vector<8x256xf32>
    %c255_i32_167 = arith.constant 255 : i32
    %182 = tpu.dynamic_rotate %178 by %c255_i32_167 dim 1 : vector<8x256xf32>, i32 -> vector<8x256xf32>
    %c15_i32_168 = arith.constant 15 : i32
    %183 = tpu.dynamic_rotate %178 by %c15_i32_168 dim 1 : vector<8x256xf32>, i32 -> vector<8x256xf32>
    %184 = arith.select %20, %182, %183 : vector<8x256xi1>, vector<8x256xf32>
    %c48_169 = arith.constant 48 : index
    %c0_170 = arith.constant 0 : index
    %185 = vector.load %arg4[%c48_169, %c0_170] : memref<72x256xf32, #tpu.memory_space<vmem>>, vector<8x256xf32>
    tpu.vector_store %arg4[%c48_169, %c0_170], %181 {strides = array<i32>} : memref<72x256xf32, #tpu.memory_space<vmem>>, vector<8x256xf32>,
    %c56_171 = arith.constant 56 : index
    %c0_172 = arith.constant 0 : index
    %186 = vector.load %arg4[%c56_171, %c0_172] : memref<72x256xf32, #tpu.memory_space<vmem>>, vector<8x256xf32>
    tpu.vector_store %arg4[%c56_171, %c0_172], %178 {strides = array<i32>} : memref<72x256xf32, #tpu.memory_space<vmem>>, vector<8x256xf32>,
    %c64_173 = arith.constant 64 : index
    %c0_174 = arith.constant 0 : index
    %187 = vector.load %arg4[%c64_173, %c0_174] : memref<72x256xf32, #tpu.memory_space<vmem>>, vector<8x256xf32>
    tpu.vector_store %arg4[%c64_173, %c0_174], %184 {strides = array<i32>} : memref<72x256xf32, #tpu.memory_space<vmem>>, vector<8x256xf32>,
    %c4 = arith.constant 4 : index
    %c0_175 = arith.constant 0 : index
    %c0_176 = arith.constant 0 : index
    %188 = vector.load %arg2[%c4, %c0_175, %c0_176] : memref<8x8x72xf32, #tpu.memory_space<vmem>>, vector<1x8x72xf32>
    %189 = vector.shape_cast %188 : vector<1x8x72xf32> to vector<8x72xf32>
    %c0_177 = arith.constant 0 : index
    %c0_178 = arith.constant 0 : index
    %190 = vector.load %arg4[%c0_177, %c0_178] : memref<72x256xf32, #tpu.memory_space<vmem>>, vector<72x256xf32>
    %cst_179 = arith.constant dense<0.000000e+00> : vector<8x256xf32>
    %191 = tpu.matmul %189, %190, %cst_179 {dimension_numbers = #tpu.dot_dimension_numbers<[1], [0], [0], [1], [0, 0, 1, 1], [], []>} : vector<8x72xf32>, vector<72x256xf32>, vector<8x256xf32> -> vector<8x256xf32>
    %192 = arith.addf %124, %191 : vector<8x256xf32>
    %193 = math.tanh %192 : vector<8x256xf32>
    %c16_i32_180 = arith.constant 16 : i32
    %194 = tpu.dynamic_rotate %193 by %c16_i32_180 dim 1 : vector<8x256xf32>, i32 -> vector<8x256xf32>
    %c1_i32_181 = arith.constant 1 : i32
    %195 = tpu.dynamic_rotate %194 by %c1_i32_181 dim 1 : vector<8x256xf32>, i32 -> vector<8x256xf32>
    %c241_i32_182 = arith.constant 241 : i32
    %196 = tpu.dynamic_rotate %194 by %c241_i32_182 dim 1 : vector<8x256xf32>, i32 -> vector<8x256xf32>
    %197 = arith.select %18, %195, %196 : vector<8x256xi1>, vector<8x256xf32>
    %c255_i32_183 = arith.constant 255 : i32
    %198 = tpu.dynamic_rotate %194 by %c255_i32_183 dim 1 : vector<8x256xf32>, i32 -> vector<8x256xf32>
    %c15_i32_184 = arith.constant 15 : i32
    %199 = tpu.dynamic_rotate %194 by %c15_i32_184 dim 1 : vector<8x256xf32>, i32 -> vector<8x256xf32>
    %200 = arith.select %20, %198, %199 : vector<8x256xi1>, vector<8x256xf32>
    %c0_185 = arith.constant 0 : index
    %c0_186 = arith.constant 0 : index
    %201 = vector.load %arg4[%c0_185, %c0_186] : memref<72x256xf32, #tpu.memory_space<vmem>>, vector<8x256xf32>
    tpu.vector_store %arg4[%c0_185, %c0_186], %197 {strides = array<i32>} : memref<72x256xf32, #tpu.memory_space<vmem>>, vector<8x256xf32>,
    %c8_187 = arith.constant 8 : index
    %c0_188 = arith.constant 0 : index
    %202 = vector.load %arg4[%c8_187, %c0_188] : memref<72x256xf32, #tpu.memory_space<vmem>>, vector<8x256xf32>
    tpu.vector_store %arg4[%c8_187, %c0_188], %194 {strides = array<i32>} : memref<72x256xf32, #tpu.memory_space<vmem>>, vector<8x256xf32>,
    %c16_189 = arith.constant 16 : index
    %c0_190 = arith.constant 0 : index
    %203 = vector.load %arg4[%c16_189, %c0_190] : memref<72x256xf32, #tpu.memory_space<vmem>>, vector<8x256xf32>
    tpu.vector_store %arg4[%c16_189, %c0_190], %200 {strides = array<i32>} : memref<72x256xf32, #tpu.memory_space<vmem>>, vector<8x256xf32>,
    %c1_i32_191 = arith.constant 1 : i32
    %204 = tpu.dynamic_rotate %193 by %c1_i32_191 dim 1 : vector<8x256xf32>, i32 -> vector<8x256xf32>
    %c241_i32_192 = arith.constant 241 : i32
    %205 = tpu.dynamic_rotate %193 by %c241_i32_192 dim 1 : vector<8x256xf32>, i32 -> vector<8x256xf32>
    %206 = arith.select %18, %204, %205 : vector<8x256xi1>, vector<8x256xf32>
    %c255_i32_193 = arith.constant 255 : i32
    %207 = tpu.dynamic_rotate %193 by %c255_i32_193 dim 1 : vector<8x256xf32>, i32 -> vector<8x256xf32>
    %c15_i32_194 = arith.constant 15 : i32
    %208 = tpu.dynamic_rotate %193 by %c15_i32_194 dim 1 : vector<8x256xf32>, i32 -> vector<8x256xf32>
    %209 = arith.select %20, %207, %208 : vector<8x256xi1>, vector<8x256xf32>
    %c24_195 = arith.constant 24 : index
    %c0_196 = arith.constant 0 : index
    %210 = vector.load %arg4[%c24_195, %c0_196] : memref<72x256xf32, #tpu.memory_space<vmem>>, vector<8x256xf32>
    tpu.vector_store %arg4[%c24_195, %c0_196], %206 {strides = array<i32>} : memref<72x256xf32, #tpu.memory_space<vmem>>, vector<8x256xf32>,
    %c32_197 = arith.constant 32 : index
    %c0_198 = arith.constant 0 : index
    %211 = vector.load %arg4[%c32_197, %c0_198] : memref<72x256xf32, #tpu.memory_space<vmem>>, vector<8x256xf32>
    tpu.vector_store %arg4[%c32_197, %c0_198], %193 {strides = array<i32>} : memref<72x256xf32, #tpu.memory_space<vmem>>, vector<8x256xf32>,
    %c40_199 = arith.constant 40 : index
    %c0_200 = arith.constant 0 : index
    %212 = vector.load %arg4[%c40_199, %c0_200] : memref<72x256xf32, #tpu.memory_space<vmem>>, vector<8x256xf32>
    tpu.vector_store %arg4[%c40_199, %c0_200], %209 {strides = array<i32>} : memref<72x256xf32, #tpu.memory_space<vmem>>, vector<8x256xf32>,
    %c240_i32_201 = arith.constant 240 : i32
    %213 = tpu.dynamic_rotate %193 by %c240_i32_201 dim 1 : vector<8x256xf32>, i32 -> vector<8x256xf32>
    %c1_i32_202 = arith.constant 1 : i32
    %214 = tpu.dynamic_rotate %213 by %c1_i32_202 dim 1 : vector<8x256xf32>, i32 -> vector<8x256xf32>
    %c241_i32_203 = arith.constant 241 : i32
    %215 = tpu.dynamic_rotate %213 by %c241_i32_203 dim 1 : vector<8x256xf32>, i32 -> vector<8x256xf32>
    %216 = arith.select %18, %214, %215 : vector<8x256xi1>, vector<8x256xf32>
    %c255_i32_204 = arith.constant 255 : i32
    %217 = tpu.dynamic_rotate %213 by %c255_i32_204 dim 1 : vector<8x256xf32>, i32 -> vector<8x256xf32>
    %c15_i32_205 = arith.constant 15 : i32
    %218 = tpu.dynamic_rotate %213 by %c15_i32_205 dim 1 : vector<8x256xf32>, i32 -> vector<8x256xf32>
    %219 = arith.select %20, %217, %218 : vector<8x256xi1>, vector<8x256xf32>
    %c48_206 = arith.constant 48 : index
    %c0_207 = arith.constant 0 : index
    %220 = vector.load %arg4[%c48_206, %c0_207] : memref<72x256xf32, #tpu.memory_space<vmem>>, vector<8x256xf32>
    tpu.vector_store %arg4[%c48_206, %c0_207], %216 {strides = array<i32>} : memref<72x256xf32, #tpu.memory_space<vmem>>, vector<8x256xf32>,
    %c56_208 = arith.constant 56 : index
    %c0_209 = arith.constant 0 : index
    %221 = vector.load %arg4[%c56_208, %c0_209] : memref<72x256xf32, #tpu.memory_space<vmem>>, vector<8x256xf32>
    tpu.vector_store %arg4[%c56_208, %c0_209], %213 {strides = array<i32>} : memref<72x256xf32, #tpu.memory_space<vmem>>, vector<8x256xf32>,
    %c64_210 = arith.constant 64 : index
    %c0_211 = arith.constant 0 : index
    %222 = vector.load %arg4[%c64_210, %c0_211] : memref<72x256xf32, #tpu.memory_space<vmem>>, vector<8x256xf32>
    tpu.vector_store %arg4[%c64_210, %c0_211], %219 {strides = array<i32>} : memref<72x256xf32, #tpu.memory_space<vmem>>, vector<8x256xf32>,
    %c5 = arith.constant 5 : index
    %c0_212 = arith.constant 0 : index
    %c0_213 = arith.constant 0 : index
    %223 = vector.load %arg2[%c5, %c0_212, %c0_213] : memref<8x8x72xf32, #tpu.memory_space<vmem>>, vector<1x8x72xf32>
    %224 = vector.shape_cast %223 : vector<1x8x72xf32> to vector<8x72xf32>
    %c0_214 = arith.constant 0 : index
    %c0_215 = arith.constant 0 : index
    %225 = vector.load %arg4[%c0_214, %c0_215] : memref<72x256xf32, #tpu.memory_space<vmem>>, vector<72x256xf32>
    %cst_216 = arith.constant dense<0.000000e+00> : vector<8x256xf32>
    %226 = tpu.matmul %224, %225, %cst_216 {dimension_numbers = #tpu.dot_dimension_numbers<[1], [0], [0], [1], [0, 0, 1, 1], [], []>} : vector<8x72xf32>, vector<72x256xf32>, vector<8x256xf32> -> vector<8x256xf32>
    %227 = math.tanh %226 : vector<8x256xf32>
    %c16_i32_217 = arith.constant 16 : i32
    %228 = tpu.dynamic_rotate %227 by %c16_i32_217 dim 1 : vector<8x256xf32>, i32 -> vector<8x256xf32>
    %c1_i32_218 = arith.constant 1 : i32
    %229 = tpu.dynamic_rotate %228 by %c1_i32_218 dim 1 : vector<8x256xf32>, i32 -> vector<8x256xf32>
    %c241_i32_219 = arith.constant 241 : i32
    %230 = tpu.dynamic_rotate %228 by %c241_i32_219 dim 1 : vector<8x256xf32>, i32 -> vector<8x256xf32>
    %231 = arith.select %18, %229, %230 : vector<8x256xi1>, vector<8x256xf32>
    %c255_i32_220 = arith.constant 255 : i32
    %232 = tpu.dynamic_rotate %228 by %c255_i32_220 dim 1 : vector<8x256xf32>, i32 -> vector<8x256xf32>
    %c15_i32_221 = arith.constant 15 : i32
    %233 = tpu.dynamic_rotate %228 by %c15_i32_221 dim 1 : vector<8x256xf32>, i32 -> vector<8x256xf32>
    %234 = arith.select %20, %232, %233 : vector<8x256xi1>, vector<8x256xf32>
    %c0_222 = arith.constant 0 : index
    %c0_223 = arith.constant 0 : index
    %235 = vector.load %arg4[%c0_222, %c0_223] : memref<72x256xf32, #tpu.memory_space<vmem>>, vector<8x256xf32>
    tpu.vector_store %arg4[%c0_222, %c0_223], %231 {strides = array<i32>} : memref<72x256xf32, #tpu.memory_space<vmem>>, vector<8x256xf32>,
    %c8_224 = arith.constant 8 : index
    %c0_225 = arith.constant 0 : index
    %236 = vector.load %arg4[%c8_224, %c0_225] : memref<72x256xf32, #tpu.memory_space<vmem>>, vector<8x256xf32>
    tpu.vector_store %arg4[%c8_224, %c0_225], %228 {strides = array<i32>} : memref<72x256xf32, #tpu.memory_space<vmem>>, vector<8x256xf32>,
    %c16_226 = arith.constant 16 : index
    %c0_227 = arith.constant 0 : index
    %237 = vector.load %arg4[%c16_226, %c0_227] : memref<72x256xf32, #tpu.memory_space<vmem>>, vector<8x256xf32>
    tpu.vector_store %arg4[%c16_226, %c0_227], %234 {strides = array<i32>} : memref<72x256xf32, #tpu.memory_space<vmem>>, vector<8x256xf32>,
    %c1_i32_228 = arith.constant 1 : i32
    %238 = tpu.dynamic_rotate %227 by %c1_i32_228 dim 1 : vector<8x256xf32>, i32 -> vector<8x256xf32>
    %c241_i32_229 = arith.constant 241 : i32
    %239 = tpu.dynamic_rotate %227 by %c241_i32_229 dim 1 : vector<8x256xf32>, i32 -> vector<8x256xf32>
    %240 = arith.select %18, %238, %239 : vector<8x256xi1>, vector<8x256xf32>
    %c255_i32_230 = arith.constant 255 : i32
    %241 = tpu.dynamic_rotate %227 by %c255_i32_230 dim 1 : vector<8x256xf32>, i32 -> vector<8x256xf32>
    %c15_i32_231 = arith.constant 15 : i32
    %242 = tpu.dynamic_rotate %227 by %c15_i32_231 dim 1 : vector<8x256xf32>, i32 -> vector<8x256xf32>
    %243 = arith.select %20, %241, %242 : vector<8x256xi1>, vector<8x256xf32>
    %c24_232 = arith.constant 24 : index
    %c0_233 = arith.constant 0 : index
    %244 = vector.load %arg4[%c24_232, %c0_233] : memref<72x256xf32, #tpu.memory_space<vmem>>, vector<8x256xf32>
    tpu.vector_store %arg4[%c24_232, %c0_233], %240 {strides = array<i32>} : memref<72x256xf32, #tpu.memory_space<vmem>>, vector<8x256xf32>,
    %c32_234 = arith.constant 32 : index
    %c0_235 = arith.constant 0 : index
    %245 = vector.load %arg4[%c32_234, %c0_235] : memref<72x256xf32, #tpu.memory_space<vmem>>, vector<8x256xf32>
    tpu.vector_store %arg4[%c32_234, %c0_235], %227 {strides = array<i32>} : memref<72x256xf32, #tpu.memory_space<vmem>>, vector<8x256xf32>,
    %c40_236 = arith.constant 40 : index
    %c0_237 = arith.constant 0 : index
    %246 = vector.load %arg4[%c40_236, %c0_237] : memref<72x256xf32, #tpu.memory_space<vmem>>, vector<8x256xf32>
    tpu.vector_store %arg4[%c40_236, %c0_237], %243 {strides = array<i32>} : memref<72x256xf32, #tpu.memory_space<vmem>>, vector<8x256xf32>,
    %c240_i32_238 = arith.constant 240 : i32
    %247 = tpu.dynamic_rotate %227 by %c240_i32_238 dim 1 : vector<8x256xf32>, i32 -> vector<8x256xf32>
    %c1_i32_239 = arith.constant 1 : i32
    %248 = tpu.dynamic_rotate %247 by %c1_i32_239 dim 1 : vector<8x256xf32>, i32 -> vector<8x256xf32>
    %c241_i32_240 = arith.constant 241 : i32
    %249 = tpu.dynamic_rotate %247 by %c241_i32_240 dim 1 : vector<8x256xf32>, i32 -> vector<8x256xf32>
    %250 = arith.select %18, %248, %249 : vector<8x256xi1>, vector<8x256xf32>
    %c255_i32_241 = arith.constant 255 : i32
    %251 = tpu.dynamic_rotate %247 by %c255_i32_241 dim 1 : vector<8x256xf32>, i32 -> vector<8x256xf32>
    %c15_i32_242 = arith.constant 15 : i32
    %252 = tpu.dynamic_rotate %247 by %c15_i32_242 dim 1 : vector<8x256xf32>, i32 -> vector<8x256xf32>
    %253 = arith.select %20, %251, %252 : vector<8x256xi1>, vector<8x256xf32>
    %c48_243 = arith.constant 48 : index
    %c0_244 = arith.constant 0 : index
    %254 = vector.load %arg4[%c48_243, %c0_244] : memref<72x256xf32, #tpu.memory_space<vmem>>, vector<8x256xf32>
    tpu.vector_store %arg4[%c48_243, %c0_244], %250 {strides = array<i32>} : memref<72x256xf32, #tpu.memory_space<vmem>>, vector<8x256xf32>,
    %c56_245 = arith.constant 56 : index
    %c0_246 = arith.constant 0 : index
    %255 = vector.load %arg4[%c56_245, %c0_246] : memref<72x256xf32, #tpu.memory_space<vmem>>, vector<8x256xf32>
    tpu.vector_store %arg4[%c56_245, %c0_246], %247 {strides = array<i32>} : memref<72x256xf32, #tpu.memory_space<vmem>>, vector<8x256xf32>,
    %c64_247 = arith.constant 64 : index
    %c0_248 = arith.constant 0 : index
    %256 = vector.load %arg4[%c64_247, %c0_248] : memref<72x256xf32, #tpu.memory_space<vmem>>, vector<8x256xf32>
    tpu.vector_store %arg4[%c64_247, %c0_248], %253 {strides = array<i32>} : memref<72x256xf32, #tpu.memory_space<vmem>>, vector<8x256xf32>,
    %c6 = arith.constant 6 : index
    %c0_249 = arith.constant 0 : index
    %c0_250 = arith.constant 0 : index
    %257 = vector.load %arg2[%c6, %c0_249, %c0_250] : memref<8x8x72xf32, #tpu.memory_space<vmem>>, vector<1x8x72xf32>
    %258 = vector.shape_cast %257 : vector<1x8x72xf32> to vector<8x72xf32>
    %c0_251 = arith.constant 0 : index
    %c0_252 = arith.constant 0 : index
    %259 = vector.load %arg4[%c0_251, %c0_252] : memref<72x256xf32, #tpu.memory_space<vmem>>, vector<72x256xf32>
    %cst_253 = arith.constant dense<0.000000e+00> : vector<8x256xf32>
    %260 = tpu.matmul %258, %259, %cst_253 {dimension_numbers = #tpu.dot_dimension_numbers<[1], [0], [0], [1], [0, 0, 1, 1], [], []>} : vector<8x72xf32>, vector<72x256xf32>, vector<8x256xf32> -> vector<8x256xf32>
    %261 = arith.addf %193, %260 : vector<8x256xf32>
    %262 = math.tanh %261 : vector<8x256xf32>
    %c16_i32_254 = arith.constant 16 : i32
    %263 = tpu.dynamic_rotate %262 by %c16_i32_254 dim 1 : vector<8x256xf32>, i32 -> vector<8x256xf32>
    %c1_i32_255 = arith.constant 1 : i32
    %264 = tpu.dynamic_rotate %263 by %c1_i32_255 dim 1 : vector<8x256xf32>, i32 -> vector<8x256xf32>
    %c241_i32_256 = arith.constant 241 : i32
    %265 = tpu.dynamic_rotate %263 by %c241_i32_256 dim 1 : vector<8x256xf32>, i32 -> vector<8x256xf32>
    %266 = arith.select %18, %264, %265 : vector<8x256xi1>, vector<8x256xf32>
    %c255_i32_257 = arith.constant 255 : i32
    %267 = tpu.dynamic_rotate %263 by %c255_i32_257 dim 1 : vector<8x256xf32>, i32 -> vector<8x256xf32>
    %c15_i32_258 = arith.constant 15 : i32
    %268 = tpu.dynamic_rotate %263 by %c15_i32_258 dim 1 : vector<8x256xf32>, i32 -> vector<8x256xf32>
    %269 = arith.select %20, %267, %268 : vector<8x256xi1>, vector<8x256xf32>
    %c0_259 = arith.constant 0 : index
    %c0_260 = arith.constant 0 : index
    %270 = vector.load %arg4[%c0_259, %c0_260] : memref<72x256xf32, #tpu.memory_space<vmem>>, vector<8x256xf32>
    tpu.vector_store %arg4[%c0_259, %c0_260], %266 {strides = array<i32>} : memref<72x256xf32, #tpu.memory_space<vmem>>, vector<8x256xf32>,
    %c8_261 = arith.constant 8 : index
    %c0_262 = arith.constant 0 : index
    %271 = vector.load %arg4[%c8_261, %c0_262] : memref<72x256xf32, #tpu.memory_space<vmem>>, vector<8x256xf32>
    tpu.vector_store %arg4[%c8_261, %c0_262], %263 {strides = array<i32>} : memref<72x256xf32, #tpu.memory_space<vmem>>, vector<8x256xf32>,
    %c16_263 = arith.constant 16 : index
    %c0_264 = arith.constant 0 : index
    %272 = vector.load %arg4[%c16_263, %c0_264] : memref<72x256xf32, #tpu.memory_space<vmem>>, vector<8x256xf32>
    tpu.vector_store %arg4[%c16_263, %c0_264], %269 {strides = array<i32>} : memref<72x256xf32, #tpu.memory_space<vmem>>, vector<8x256xf32>,
    %c1_i32_265 = arith.constant 1 : i32
    %273 = tpu.dynamic_rotate %262 by %c1_i32_265 dim 1 : vector<8x256xf32>, i32 -> vector<8x256xf32>
    %c241_i32_266 = arith.constant 241 : i32
    %274 = tpu.dynamic_rotate %262 by %c241_i32_266 dim 1 : vector<8x256xf32>, i32 -> vector<8x256xf32>
    %275 = arith.select %18, %273, %274 : vector<8x256xi1>, vector<8x256xf32>
    %c255_i32_267 = arith.constant 255 : i32
    %276 = tpu.dynamic_rotate %262 by %c255_i32_267 dim 1 : vector<8x256xf32>, i32 -> vector<8x256xf32>
    %c15_i32_268 = arith.constant 15 : i32
    %277 = tpu.dynamic_rotate %262 by %c15_i32_268 dim 1 : vector<8x256xf32>, i32 -> vector<8x256xf32>
    %278 = arith.select %20, %276, %277 : vector<8x256xi1>, vector<8x256xf32>
    %c24_269 = arith.constant 24 : index
    %c0_270 = arith.constant 0 : index
    %279 = vector.load %arg4[%c24_269, %c0_270] : memref<72x256xf32, #tpu.memory_space<vmem>>, vector<8x256xf32>
    tpu.vector_store %arg4[%c24_269, %c0_270], %275 {strides = array<i32>} : memref<72x256xf32, #tpu.memory_space<vmem>>, vector<8x256xf32>,
    %c32_271 = arith.constant 32 : index
    %c0_272 = arith.constant 0 : index
    %280 = vector.load %arg4[%c32_271, %c0_272] : memref<72x256xf32, #tpu.memory_space<vmem>>, vector<8x256xf32>
    tpu.vector_store %arg4[%c32_271, %c0_272], %262 {strides = array<i32>} : memref<72x256xf32, #tpu.memory_space<vmem>>, vector<8x256xf32>,
    %c40_273 = arith.constant 40 : index
    %c0_274 = arith.constant 0 : index
    %281 = vector.load %arg4[%c40_273, %c0_274] : memref<72x256xf32, #tpu.memory_space<vmem>>, vector<8x256xf32>
    tpu.vector_store %arg4[%c40_273, %c0_274], %278 {strides = array<i32>} : memref<72x256xf32, #tpu.memory_space<vmem>>, vector<8x256xf32>,
    %c240_i32_275 = arith.constant 240 : i32
    %282 = tpu.dynamic_rotate %262 by %c240_i32_275 dim 1 : vector<8x256xf32>, i32 -> vector<8x256xf32>
    %c1_i32_276 = arith.constant 1 : i32
    %283 = tpu.dynamic_rotate %282 by %c1_i32_276 dim 1 : vector<8x256xf32>, i32 -> vector<8x256xf32>
    %c241_i32_277 = arith.constant 241 : i32
    %284 = tpu.dynamic_rotate %282 by %c241_i32_277 dim 1 : vector<8x256xf32>, i32 -> vector<8x256xf32>
    %285 = arith.select %18, %283, %284 : vector<8x256xi1>, vector<8x256xf32>
    %c255_i32_278 = arith.constant 255 : i32
    %286 = tpu.dynamic_rotate %282 by %c255_i32_278 dim 1 : vector<8x256xf32>, i32 -> vector<8x256xf32>
    %c15_i32_279 = arith.constant 15 : i32
    %287 = tpu.dynamic_rotate %282 by %c15_i32_279 dim 1 : vector<8x256xf32>, i32 -> vector<8x256xf32>
    %288 = arith.select %20, %286, %287 : vector<8x256xi1>, vector<8x256xf32>
    %c48_280 = arith.constant 48 : index
    %c0_281 = arith.constant 0 : index
    %289 = vector.load %arg4[%c48_280, %c0_281] : memref<72x256xf32, #tpu.memory_space<vmem>>, vector<8x256xf32>
    tpu.vector_store %arg4[%c48_280, %c0_281], %285 {strides = array<i32>} : memref<72x256xf32, #tpu.memory_space<vmem>>, vector<8x256xf32>,
    %c56_282 = arith.constant 56 : index
    %c0_283 = arith.constant 0 : index
    %290 = vector.load %arg4[%c56_282, %c0_283] : memref<72x256xf32, #tpu.memory_space<vmem>>, vector<8x256xf32>
    tpu.vector_store %arg4[%c56_282, %c0_283], %282 {strides = array<i32>} : memref<72x256xf32, #tpu.memory_space<vmem>>, vector<8x256xf32>,
    %c64_284 = arith.constant 64 : index
    %c0_285 = arith.constant 0 : index
    %291 = vector.load %arg4[%c64_284, %c0_285] : memref<72x256xf32, #tpu.memory_space<vmem>>, vector<8x256xf32>
    tpu.vector_store %arg4[%c64_284, %c0_285], %288 {strides = array<i32>} : memref<72x256xf32, #tpu.memory_space<vmem>>, vector<8x256xf32>,
    %c7 = arith.constant 7 : index
    %c0_286 = arith.constant 0 : index
    %c0_287 = arith.constant 0 : index
    %292 = vector.load %arg2[%c7, %c0_286, %c0_287] : memref<8x8x72xf32, #tpu.memory_space<vmem>>, vector<1x8x72xf32>
    %293 = vector.shape_cast %292 : vector<1x8x72xf32> to vector<8x72xf32>
    %c0_288 = arith.constant 0 : index
    %c0_289 = arith.constant 0 : index
    %294 = vector.load %arg4[%c0_288, %c0_289] : memref<72x256xf32, #tpu.memory_space<vmem>>, vector<72x256xf32>
    %cst_290 = arith.constant dense<0.000000e+00> : vector<8x256xf32>
    %295 = tpu.matmul %293, %294, %cst_290 {dimension_numbers = #tpu.dot_dimension_numbers<[1], [0], [0], [1], [0, 0, 1, 1], [], []>} : vector<8x72xf32>, vector<72x256xf32>, vector<8x256xf32> -> vector<8x256xf32>
    %cst_291 = arith.constant 1.001000e+00 : f32
    %296 = vector.broadcast %cst_291 : f32 to vector<8x256xf32>
    %297 = arith.cmpf oge, %295, %296 : vector<8x256xf32>
    %cst_292 = arith.constant 1.001000e+00 : f32
    %298 = vector.broadcast %cst_292 : f32 to vector<8x256xf32>
    %299 = arith.select %297, %298, %295 : vector<8x256xi1>, vector<8x256xf32>
    %cst_293 = arith.constant -1.001000e+00 : f32
    %300 = vector.broadcast %cst_293 : f32 to vector<8x256xf32>
    %301 = arith.cmpf ole, %299, %300 : vector<8x256xf32>
    %cst_294 = arith.constant -1.001000e+00 : f32
    %302 = vector.broadcast %cst_294 : f32 to vector<8x256xf32>
    %303 = arith.select %301, %302, %299 : vector<8x256xi1>, vector<8x256xf32>
    %c0_295 = arith.constant 0 : index
    %c0_296 = arith.constant 0 : index
    %c0_297 = arith.constant 0 : index
    %304 = vector.load %arg3[%c0_295, %c0_296, %c0_297] : memref<1x8x256xf32, #tpu.memory_space<vmem>>, vector<1x8x256xf32>
    %305 = vector.shape_cast %304 : vector<1x8x256xf32> to vector<8x256xf32>
    %306 = vector.shape_cast %303 : vector<8x256xf32> to vector<1x8x256xf32>
    tpu.vector_store %arg3[%c0_295, %c0_296, %c0_297], %306 {strides = array<i32>} : memref<1x8x256xf32, #tpu.memory_space<vmem>>, vector<1x8x256xf32>,
    return
  }
  func.func @transform_0(%arg0: i32) -> (i32, i32, i32) {
    %c0_i32 = arith.constant 0 : i32
    %c0_i32_0 = arith.constant 0 : i32
    %c0_i32_1 = arith.constant 0 : i32
    return %arg0, %c0_i32, %c0_i32_0 : i32, i32, i32
  }
  func.func @transform_1(%arg0: i32) -> (i32, i32, i32) {
    %c0_i32 = arith.constant 0 : i32
    %c0_i32_0 = arith.constant 0 : i32
    %c0_i32_1 = arith.constant 0 : i32
    %c0_i32_2 = arith.constant 0 : i32
    return %c0_i32, %c0_i32_0, %c0_i32_1 : i32, i32, i32
  }
  func.func @transform_2(%arg0: i32) -> (i32, i32, i32) {
    %c0_i32 = arith.constant 0 : i32
    %c0_i32_0 = arith.constant 0 : i32
    %c0_i32_1 = arith.constant 0 : i32
    return %arg0, %c0_i32, %c0_i32_0 : i32, i32, i32
  }
}

</mosaic_0001>

<bundles_post_ra>
// kernel: cnn_cn_forward.1
= control target key start
LH: loop header
LB: loop body
LE: loop exit
PB: predicated region body
PF: predicated region fallthrough
CT: control target
= control target key end

     0   :  { %s2345_s9 = smov 0   ;;  %s3341_s0 = inlined_call_operand.vmem [shape: f32[2,8,256], index: 0, kind: input, shape index: {}]   ;;  %s3342_s1 = inlined_call_operand.vmem [shape: f32[8,8,72], index: 1, kind: input, shape index: {}]   ;;  %s3343_s2 = inlined_call_operand.vmem [shape: f32[2,8,256], index: 2, kind: output, shape index: {}]  }
   0x1 LB: > { %s1682_s10 = sadd.s32 4294967295, %s2322_s9   ;;  %p1686_p0 = scmp.ge.s32.totalorder %s2322_s9, 1  ;;  %s2322_s9 = sphi %s2345_s9, %s12_s9  }
   0x2   : > { %p112_p1 = scmp.lt.s32.totalorder %s2322_s9, 3 }
   0x4   : > { %p113_p2 = pnand %p1686_p0, %p112_p1 }
   0x5   : > { %p134_p3 = scmp.lt.s32.totalorder (!%p113_p2), %s1682_s10, 1  ;;  %s2324_s15 = smov (!%p113_p2), 112  }
   0x6   : > { %116 = sbr.rel (%p113_p2) target bundleno = 3169 (0xc61), region = 28  ;;  %s2325_s16 = smov (!%p113_p2), 1  }
   0x7   : > { %s2326_s17 = smov (!%p113_p2), 15   ;;  %s2327_s18 = smov (!%p113_p2), 16  }
   0x8   : > { %s2328_s19 = smov (!%p113_p2), 127   ;;  %s2329_s20 = smov (!%p113_p2), 113  }
   0xb   : > { %s3353_s10 = smov (!%p134_p3, %s1682_s10), 1  ;;  %v144_v3 = vlaneseq  ;;  %vm316_vm10 = vcmask 588800  }
   0xc   : > { %s1716_s11 = sshll.u32 %s3353_s10, 4 }
   0xd   : > { %s138_s14 = scalar_lea.vmem %s3341_s0, %s1716_s11  ;;  %v2373_v4 = vand.u32 127, %v144_v3 }
   0xe   : > { %v2361_v0 = vld [vmem:[%s138_s14] sm:$0xff]  ;;  %v2363_v1 = vld [vmem:[%s138_s14 + $0x8] sm:$0xff]  ;;  %s143_s14 = scalar_lea.vmem %s3343_s2, %s1716_s11 }
   0xf   : > { %v1732_v2 = vpack.i.bf16 %v2363_v1, %v2361_v0  ;;  %vm260_vm0 = vcmp.lt.s32.totalorder %v2373_v4, 112  ;;  %vm181_vm1 = vcmp.lt.s32.totalorder %v2373_v4, 16  ;;  %v146_v22 = vadd.s32 128, %v2373_v4 }
  0x10   : > { %v151_v23 = vand.u32 15, %v2373_v4  ;;  %vm188_vm2 = vcmp.lt.s32.totalorder %v2373_v4, 1  ;;  %vm195_vm3 = vcmp.lt.s32.totalorder %v2373_v4, 113  ;;  %vm204_vm4 = vcmp.lt.s32.totalorder %v2373_v4, 127 }
  0x11   : > { %1733 = vrot.lane.b32.xlu0 %v1732_v2, %s2324_s15  ;;  %1753 = vrot.lane.b32.xlu2 %v1732_v2, %s2325_s16  ;;  %v158_v24 = vand.u32 15, %v146_v22  ;;  %vm211_vm6 = vcmp.lt.s32.totalorder %v2373_v4, 15 }
  0x12   : > { %1748 = vrot.lane.b32.xlu1 %v1732_v2, %s2326_s17  ;;  %vm2412_vm5 = vcmp.gt.s32.totalorder %v151_v23, 0  ;;  %vm2417_vm7 = vcmp.lt.s32.totalorder %v151_v23, 15 }
  0x13   : > { %vm2421_vm8 = vcmp.lt.s32.totalorder %v158_v24, 15  ;;  %vm2433_vm9 = vcmp.gt.s32.totalorder %v158_v24, 0 }
  0x19   : > { %1738 = vrot.lane.b32.xlu0 %v1732_v2, %s2327_s18 }
  0x21   : > { %1743 = vrot.lane.b32.xlu0 %v1732_v2, %s2328_s19 }
  0x29   : > { %1758 = vrot.lane.b32.xlu0 %v1732_v2, %s2329_s20 }
  0x6b   : > { %v2405_v17 = vpop.permute.xlu2 %1753 }
  0x6c   : > { %v1756_v48 = vunpack.i.h.bf16 %v2405_v17  ;;  %v1755_v51 = vunpack.i.l.bf16 %v2405_v17 }
  0x83   : > { %v1734_v5 = vpop.permute.xlu0 %1733 }
  0x84   : > { %v1736_v6 = vunpack.i.h.bf16 %v1734_v5  ;;  %v1735_v7 = vunpack.i.l.bf16 %v1734_v5  ;;  %v1749_v18 = vpop.permute.xlu1 %1748 }
  0x85   : > { %v1751_v40 = vunpack.i.h.bf16 %v1749_v18  ;;  %v1750_v41 = vunpack.i.l.bf16 %v1749_v18 }
  0x86   : > { %v2378_v8 = vsel %vm260_vm0, %v1735_v7, %v1736_v6  ;;  %v2382_v9 = vsel %vm260_vm0, %v1736_v6, %v1735_v7 }
  0x87   : > { %v1772_v10 = vpack.i.bf16 %v2382_v9, %v2378_v8  ;;  %v247_v57 = vsel %vm211_vm6, %v1751_v40, %v1750_v41  ;;  %v246_v61 = vsel %vm211_vm6, %v1750_v41, %v1751_v40 }
  0x89   : > { %1773 = vrot.lane.b32.xlu2 %v1772_v10, %s2325_s16  ;;  %1763 = vrot.lane.b32.xlu1 %v1772_v10, %s2328_s19 }
  0x8b   : > { %v1739_v11 = vpop.permute.xlu0 %1738 }
  0x8c   : > { %v1741_v12 = vunpack.i.h.bf16 %v1739_v11  ;;  %v1740_v13 = vunpack.i.l.bf16 %v1739_v11 }
  0x8e   : > { %v2391_v14 = vsel %vm181_vm1, %v1740_v13, %v1741_v12  ;;  %v2395_v15 = vsel %vm181_vm1, %v1741_v12, %v1740_v13 }
  0x8f   : > { %v1792_v16 = vpack.i.bf16 %v2391_v14, %v2395_v15 }
  0x91   : > { %1778 = vrot.lane.b32.xlu2 %v1772_v10, %s2329_s20  ;;  %1768 = vrot.lane.b32.xlu1 %v1772_v10, %s2326_s17 }
  0x92   : > { %1793 = vrot.lane.b32.xlu0 %v1792_v16, %s2325_s16 }
  0x93   : > { %v1744_v21 = vpop.permute.xlu0 %1743 }
  0x94   : > { %v1746_v31 = vunpack.i.h.bf16 %v1744_v21  ;;  %v1745_v32 = vunpack.i.l.bf16 %v1744_v21 }
  0x96   : > { %v240_v54 = vsel %vm204_vm4, %v1745_v32, %v1746_v31  ;;  %v241_v58 = vsel %vm204_vm4, %v1746_v31, %v1745_v32 }
  0x97   : > { %v248_v7 = vsel %vm2417_vm7, %v240_v54, %v247_v57 }
  0x99   : > { %1788 = vrot.lane.b32.xlu2 %v1792_v16, %s2326_s17  ;;  %1783 = vrot.lane.b32.xlu1 %v1792_v16, %s2328_s19 }
  0x9b   : > { %v1759_v42 = vpop.permute.xlu0 %1758 }
  0x9c   : > { %v1761_v55 = vunpack.i.h.bf16 %v1759_v42  ;;  %v1760_v56 = vunpack.i.l.bf16 %v1759_v42 }
  0x9e   : > { %v232_v10 = vsel %vm195_vm3, %v1760_v56, %v1761_v55  ;;  %v233_v17 = vsel %vm195_vm3, %v1761_v55, %v1760_v56 }
  0xa1   : > { %1798 = vrot.lane.b32.xlu1 %v1792_v16, %s2329_s20  ;;  %v226_v16 = vsel %vm188_vm2, %v1755_v51, %v1756_v48 }
  0xa2   : > { %v235_v23 = vsel %vm2433_vm9, %v226_v16, %v233_v17 }
  0xe3   : > { %v1774_v19 = vpop.permute.xlu2 %1773 }
  0xe4   : > { %v1776_v38 = vunpack.i.h.bf16 %v1774_v19  ;;  %v1775_v39 = vunpack.i.l.bf16 %v1774_v19 }
  0xe6   : > { %v268_v59 = vsel %vm188_vm2, %v1776_v38, %v1775_v39  ;;  %v267_v60 = vsel %vm188_vm2, %v1775_v39, %v1776_v38 }
  0xeb   : > { %v1779_v25 = vpop.permute.xlu2 %1778 }
  0xec   : > { %v1781_v34 = vunpack.i.h.bf16 %v1779_v25  ;;  %v1780_v35 = vunpack.i.l.bf16 %v1779_v25 }
  0xee   : > { %v273_v52 = vsel %vm195_vm3, %v1780_v35, %v1781_v34  ;;  %v274_v53 = vsel %vm195_vm3, %v1781_v34, %v1780_v35 }
  0xef   : > { %v275_v2 = vsel %vm2412_vm5, %v268_v59, %v273_v52  ;;  %v276_v3 = vsel %vm2433_vm9, %v267_v60, %v274_v53 }
  0xf3   : > { %v1789_v62 = vpop.permute.xlu2 %1788 }
  0xf4   : > { %v1791_v11 = vunpack.i.h.bf16 %v1789_v62  ;;  %v1790_v12 = vunpack.i.l.bf16 %v1789_v62 }
  0xfb   : > { %v1764_v20 = vpop.permute.xlu1 %1763 }
  0xfc   : > { %v1766_v27 = vunpack.i.h.bf16 %v1764_v20  ;;  %v1765_v28 = vunpack.i.l.bf16 %v1764_v20 }
  0xfe   : > { %v281_v43 = vsel %vm204_vm4, %v1765_v28, %v1766_v27  ;;  %v282_v45 = vsel %vm204_vm4, %v1766_v27, %v1765_v28 }
 0x103   : > { %v1769_v33 = vpop.permute.xlu1 %1768 }
 0x104   : > { %v1771_v36 = vunpack.i.h.bf16 %v1769_v33  ;;  %v1770_v37 = vunpack.i.l.bf16 %v1769_v33  ;;  %v1794_v13 = vpop.permute.xlu0 %1793 }
 0x105   : > { %v1796_v20 = vunpack.i.h.bf16 %v1794_v13  ;;  %v1795_v21 = vunpack.i.l.bf16 %v1794_v13 }
 0x106   : > { %v288_v44 = vsel %vm211_vm6, %v1771_v36, %v1770_v37  ;;  %v287_v46 = vsel %vm211_vm6, %v1770_v37, %v1771_v36  ;;  %v297_v36 = vld [vmem:[%s3342_s1] sm:$0xff] }
 0x107   : > { %v289_v49 = vsel %vm2417_vm7, %v281_v43, %v288_v44  ;;  %v290_v50 = vsel %vm2421_vm8, %v282_v45, %v287_v46  ;;  %v190_v32 = vsel %vm188_vm2, %v1796_v20, %v1795_v21  ;;  %v189_v34 = vsel %vm188_vm2, %v1795_v21, %v1796_v20 }
 0x108   : > { %327 = vmatpush.msra.mxu0 %v289_v49  ;;  %347 = vmatpush.msra.mxu1 %v290_v50 }
 0x10a   : > { %328 = vmatpush.msra.mxu0 %v2378_v8  ;;  %348 = vmatpush.msra.mxu1 %v2382_v9  ;;  %v249_v8 = vsel %vm2421_vm8, %v241_v58, %v246_v61  ;;  %v227_v9 = vsel %vm188_vm2, %v1756_v48, %v1755_v51 }
 0x10b   : > { %v1784_v63 = vpop.permute.xlu1 %1783  ;;  %v234_v22 = vsel %vm2412_vm5, %v227_v9, %v232_v10 }
 0x10c   : > { %v1786_v5 = vunpack.i.h.bf16 %v1784_v63  ;;  %v1785_v6 = vunpack.i.l.bf16 %v1784_v63  ;;  %329 = vmatpush.msra.mxu0 %v275_v2  ;;  %349 = vmatpush.msra.mxu1 %v276_v3 }
 0x10e   : > { %330 = vmatpush.msra.mxu0 %v248_v7  ;;  %350 = vmatpush.msra.mxu1 %v249_v8  ;;  %v205_v18 = vsel %vm204_vm4, %v1785_v6, %v1786_v5  ;;  %v206_v19 = vsel %vm204_vm4, %v1786_v5, %v1785_v6 }
 0x110   : > { %331 = vmatpush.msra.mxu0 %v2361_v0  ;;  %351 = vmatpush.msra.mxu1 %v2363_v1  ;;  %v213_v0 = vsel %vm211_vm6, %v1791_v11, %v1790_v12  ;;  %v212_v1 = vsel %vm211_vm6, %v1790_v12, %v1791_v11 }
 0x111   : > { %v214_v25 = vsel %vm2417_vm7, %v205_v18, %v213_v0  ;;  %v215_v27 = vsel %vm2421_vm8, %v206_v19, %v212_v1 }
 0x112   : > { %332 = vmatpush.msra.mxu0 %v234_v22  ;;  %352 = vmatpush.msra.mxu1 %v235_v23 }
 0x113   : > { %v1799_v24 = vpop.permute.xlu1 %1798 }
 0x114   : > { %v1801_v28 = vunpack.i.h.bf16 %v1799_v24  ;;  %v1800_v31 = vunpack.i.l.bf16 %v1799_v24  ;;  %333 = vmatpush.msra.mxu0 %v214_v25  ;;  %353 = vmatpush.msra.mxu1 %v215_v27 }
 0x116   : > { %334 = vmatpush.msra.mxu0 %v2395_v15  ;;  %354 = vmatpush.msra.mxu1 %v2391_v14  ;;  %v196_v33 = vsel %vm195_vm3, %v1800_v31, %v1801_v28  ;;  %v197_v35 = vsel %vm195_vm3, %v1801_v28, %v1800_v31 }
 0x117   : > { %v198_v37 = vsel %vm2412_vm5, %v190_v32, %v196_v33  ;;  %v199_v14 = vsel %vm2433_vm9, %v189_v34, %v197_v35 }
 0x118   : > { %335 = vmatpush.msra.mxu0 %v198_v37  ;;  %355 = vmatpush.msra.mxu1 %v199_v14 }
 0x119   : > { %1691 = vmatmul.msk.f32.vlgmr.msra.gmra.mxu0 %vm316_vm10, %v297_v36  ;;  %1692 = vmatmul.msk.f32.vlgmr.msra.gmra.mxu1 %vm316_vm10, %v297_v36 }
 0x196   : > { %v2514_v15 = vpop.f32.mrf.mxu0  ;;  %v2516_v38 = vpop.f32.mrf.mxu1 }
 0x197   : > { %v1822_v39 = vpack.i.bf16 %v2516_v38, %v2514_v15 }
 0x199   : > { %1823 = vrot.lane.b32.xlu1 %v1822_v39, %s2325_s16  ;;  %1808 = vrot.lane.b32.xlu0 %v1822_v39, %s2327_s18 }
 0x19a   : > { %1803 = vrot.lane.b32.xlu2 %v1822_v39, %s2324_s15 }
 0x1a1   : > { %1818 = vrot.lane.b32.xlu0 %v1822_v39, %s2326_s17 }
 0x1a2   : > { %1813 = vrot.lane.b32.xlu2 %v1822_v39, %s2328_s19 }
 0x1f4   : > { %v1804_v40 = vpop.permute.xlu2 %1803 }
 0x1f5   : > { %v1806_v41 = vunpack.i.h.bf16 %v1804_v40  ;;  %v1805_v42 = vunpack.i.l.bf16 %v1804_v40 }
 0x1f7   : > { %v438_v43 = vsel %vm260_vm0, %v1805_v42, %v1806_v41  ;;  %v439_v44 = vsel %vm260_vm0, %v1806_v41, %v1805_v42 }
 0x1f8   : > { %v1842_v45 = vpack.i.bf16 %v439_v44, %v438_v43 }
 0x1fa   : > { %1843 = vrot.lane.b32.xlu0 %v1842_v45, %s2325_s16  ;;  %1833 = vrot.lane.b32.xlu2 %v1842_v45, %s2326_s17 }
 0x1fb   : > { %1828 = vrot.lane.b32.xlu1 %v1842_v45, %s2328_s19 }
 0x1fc   : > { %v1814_v53 = vpop.permute.xlu2 %1813 }
 0x1fd   : > { %v1816_v16 = vunpack.i.h.bf16 %v1814_v53  ;;  %v1815_v17 = vunpack.i.l.bf16 %v1814_v53 }
 0x1ff   : > { %v418_v33 = vsel %vm204_vm4, %v1815_v17, %v1816_v16  ;;  %v419_v34 = vsel %vm204_vm4, %v1816_v16, %v1815_v17 }
 0x202   : > { %1838 = vrot.lane.b32.xlu2 %v1822_v39, %s2329_s20 }
 0x203   : > { %1848 = vrot.lane.b32.xlu1 %v1842_v45, %s2329_s20 }
 0x20b   : > { %v1809_v46 = vpop.permute.xlu0 %1808  ;;  %v1824_v54 = vpop.permute.xlu1 %1823 }
 0x20c   : > { %v1811_v48 = vunpack.i.h.bf16 %v1809_v46  ;;  %v1810_v49 = vunpack.i.l.bf16 %v1809_v46  ;;  %v1826_v31 = vunpack.i.h.bf16 %v1824_v54  ;;  %v1825_v32 = vunpack.i.l.bf16 %v1824_v54 }
 0x20e   : > { %v2536_v50 = vsel %vm181_vm1, %v1810_v49, %v1811_v48  ;;  %v2540_v51 = vsel %vm181_vm1, %v1811_v48, %v1810_v49  ;;  %v405_v39 = vsel %vm188_vm2, %v1826_v31, %v1825_v32  ;;  %v404_v40 = vsel %vm188_vm2, %v1825_v32, %v1826_v31 }
 0x20f   : > { %v1852_v52 = vpack.i.bf16 %v2536_v50, %v2540_v51 }
 0x211   : > { %1853 = vrot.lane.b32.xlu0 %v1852_v52, %s2328_s19  ;;  %1863 = vrot.lane.b32.xlu2 %v1852_v52, %s2325_s16 }
 0x212   : > { %1858 = vrot.lane.b32.xlu1 %v1852_v52, %s2326_s17 }
 0x213   : > { %v1819_v55 = vpop.permute.xlu0 %1818 }
 0x214   : > { %v1821_v8 = vunpack.i.h.bf16 %v1819_v55  ;;  %v1820_v9 = vunpack.i.l.bf16 %v1819_v55 }
 0x216   : > { %v425_v22 = vsel %vm211_vm6, %v1821_v8, %v1820_v9  ;;  %v424_v23 = vsel %vm211_vm6, %v1820_v9, %v1821_v8 }
 0x217   : > { %v426_v35 = vsel %vm2417_vm7, %v418_v33, %v425_v22  ;;  %v427_v36 = vsel %vm2421_vm8, %v419_v34, %v424_v23 }
 0x219   : > { %1868 = vrot.lane.b32.xlu0 %v1852_v52, %s2329_s20 }
 0x254   : > { %v1834_v56 = vpop.permute.xlu2 %1833 }
 0x255   : > { %v1836_v57 = vunpack.i.h.bf16 %v1834_v56  ;;  %v1835_v58 = vunpack.i.l.bf16 %v1834_v56 }
 0x257   : > { %v465_v63 = vsel %vm211_vm6, %v1836_v57, %v1835_v58  ;;  %v464_v3 = vsel %vm211_vm6, %v1835_v58, %v1836_v57 }
 0x25c   : > { %v1839_v10 = vpop.permute.xlu2 %1838 }
 0x25d   : > { %v1841_v20 = vunpack.i.h.bf16 %v1839_v10  ;;  %v1840_v21 = vunpack.i.l.bf16 %v1839_v10 }
 0x25f   : > { %v410_v37 = vsel %vm195_vm3, %v1840_v21, %v1841_v20  ;;  %v411_v14 = vsel %vm195_vm3, %v1841_v20, %v1840_v21 }
 0x260   : > { %v412_v41 = vsel %vm2412_vm5, %v405_v39, %v410_v37  ;;  %v413_v42 = vsel %vm2433_vm9, %v404_v40, %v411_v14 }
 0x26b   : > { %v1864_v54 = vpop.permute.xlu2 %1863 }
 0x26c   : > { %v1844_v5 = vpop.permute.xlu0 %1843 }
 0x26d   : > { %v1829_v59 = vpop.permute.xlu1 %1828  ;;  %v1846_v11 = vunpack.i.h.bf16 %v1844_v5  ;;  %v1845_v12 = vunpack.i.l.bf16 %v1844_v5 }
 0x26e   : > { %v1831_v60 = vunpack.i.h.bf16 %v1829_v59  ;;  %v1830_v61 = vunpack.i.l.bf16 %v1829_v59  ;;  %v1866_v59 = vunpack.i.h.bf16 %v1864_v54 }
 0x26f   : > { %v445_v0 = vsel %vm188_vm2, %v1846_v11, %v1845_v12  ;;  %v444_v24 = vsel %vm188_vm2, %v1845_v12, %v1846_v11 }
 0x270   : > { %v458_v62 = vsel %vm204_vm4, %v1830_v61, %v1831_v60  ;;  %v459_v2 = vsel %vm204_vm4, %v1831_v60, %v1830_v61  ;;  %v1865_v60 = vunpack.i.l.bf16 %v1864_v54 }
 0x271   : > { %v466_v6 = vsel %vm2417_vm7, %v458_v62, %v465_v63  ;;  %v467_v7 = vsel %vm2421_vm8, %v459_v2, %v464_v3 }
 0x272   : > { %504 = vmatpush.msra.mxu2 %v466_v6  ;;  %524 = vmatpush.msra.mxu3 %v467_v7  ;;  %v371_v2 = vsel %vm188_vm2, %v1866_v59, %v1865_v60  ;;  %v370_v5 = vsel %vm188_vm2, %v1865_v60, %v1866_v59 }
 0x274   : > { %505 = vmatpush.msra.mxu2 %v438_v43  ;;  %525 = vmatpush.msra.mxu3 %v439_v44 }
 0x275   : > { %v1849_v13 = vpop.permute.xlu1 %1848 }
 0x276   : > { %v1851_v18 = vunpack.i.h.bf16 %v1849_v13  ;;  %v1850_v19 = vunpack.i.l.bf16 %v1849_v13 }
 0x278   : > { %v450_v1 = vsel %vm195_vm3, %v1850_v19, %v1851_v18  ;;  %v451_v25 = vsel %vm195_vm3, %v1851_v18, %v1850_v19 }
 0x279   : > { %v452_v27 = vsel %vm2412_vm5, %v445_v0, %v450_v1  ;;  %v453_v28 = vsel %vm2433_vm9, %v444_v24, %v451_v25 }
 0x27a   : > { %506 = vmatpush.msra.mxu2 %v452_v27  ;;  %526 = vmatpush.msra.mxu3 %v453_v28 }
 0x27c   : > { %507 = vmatpush.msra.mxu2 %v426_v35  ;;  %527 = vmatpush.msra.mxu3 %v427_v36 }
 0x27e   : > { %508 = vmatpush.msra.mxu2 %v2514_v15  ;;  %528 = vmatpush.msra.mxu3 %v2516_v38 }
 0x280   : > { %509 = vmatpush.msra.mxu2 %v412_v41  ;;  %529 = vmatpush.msra.mxu3 %v413_v42 }
 0x283   : > { %v1854_v43 = vpop.permute.xlu0 %1853 }
 0x284   : > { %v1856_v44 = vunpack.i.h.bf16 %v1854_v43  ;;  %v1855_v45 = vunpack.i.l.bf16 %v1854_v43  ;;  %v1859_v46 = vpop.permute.xlu1 %1858 }
 0x285   : > { %v1861_v48 = vunpack.i.h.bf16 %v1859_v46  ;;  %v1860_v49 = vunpack.i.l.bf16 %v1859_v46 }
 0x286   : > { %v384_v52 = vsel %vm204_vm4, %v1855_v45, %v1856_v44  ;;  %v385_v53 = vsel %vm204_vm4, %v1856_v44, %v1855_v45 }
 0x287   : > { %v391_v55 = vsel %vm211_vm6, %v1861_v48, %v1860_v49  ;;  %v390_v56 = vsel %vm211_vm6, %v1860_v49, %v1861_v48 }
 0x288   : > { %v392_v57 = vsel %vm2417_vm7, %v384_v52, %v391_v55  ;;  %v393_v58 = vsel %vm2421_vm8, %v385_v53, %v390_v56 }
 0x289   : > { %510 = vmatpush.msra.mxu2 %v392_v57  ;;  %530 = vmatpush.msra.mxu3 %v393_v58 }
 0x28b   : > { %511 = vmatpush.msra.mxu2 %v2540_v51  ;;  %531 = vmatpush.msra.mxu3 %v2536_v50  ;;  %v1869_v61 = vpop.permute.xlu0 %1868  ;;  %v1693_v51 = vld [vmem:[%s3342_s1 + $0x8] sm:$0xff] }
 0x28c   : > { %v1871_v62 = vunpack.i.h.bf16 %v1869_v61  ;;  %v1870_v63 = vunpack.i.l.bf16 %v1869_v61 }
 0x28e   : > { %v376_v3 = vsel %vm195_vm3, %v1870_v63, %v1871_v62  ;;  %v377_v6 = vsel %vm195_vm3, %v1871_v62, %v1870_v63 }
 0x28f   : > { %v378_v50 = vsel %vm2412_vm5, %v371_v2, %v376_v3  ;;  %v379_v7 = vsel %vm2433_vm9, %v370_v5, %v377_v6 }
 0x290   : > { %512 = vmatpush.msra.mxu2 %v378_v50  ;;  %532 = vmatpush.msra.mxu3 %v379_v7 }
 0x291   : > { %1694 = vmatmul.msk.f32.vlgmr.msra.gmra.mxu2 %vm316_vm10, %v1693_v51  ;;  %1695 = vmatmul.msk.f32.vlgmr.msra.gmra.mxu3 %vm316_vm10, %v1693_v51 }
 0x314   : > { %v514_v8 = vpop.f32.mrf.mxu2  ;;  %v534_v9 = vpop.f32.mrf.mxu3 }
 0x315   : > { %2292 = vtanh.f32 %v514_v8 }
 0x316   : > { %2294 = vtanh.f32 %v534_v9 }
 0x31b   : > { %v2629_v10 = vpop.eup %2292 }
 0x31c   : > { %v2631_v11 = vpop.eup %2294 }
 0x31d   : > { %v1892_v12 = vpack.i.bf16 %v2631_v11, %v2629_v10 }
 0x31f   : > { %1893 = vrot.lane.b32.xlu0 %v1892_v12, %s2325_s16  ;;  %1878 = vrot.lane.b32.xlu2 %v1892_v12, %s2327_s18 }
 0x320   : > { %1873 = vrot.lane.b32.xlu1 %v1892_v12, %s2324_s15 }
 0x327   : > { %1888 = vrot.lane.b32.xlu2 %v1892_v12, %s2326_s17 }
 0x328   : > { %1883 = vrot.lane.b32.xlu1 %v1892_v12, %s2328_s19 }
 0x379   : > { %v1879_v18 = vpop.permute.xlu2 %1878 }
 0x37a   : > { %v1881_v22 = vunpack.i.h.bf16 %v1879_v18  ;;  %v1880_v23 = vunpack.i.l.bf16 %v1879_v18 }
 0x37c   : > { %v2649_v0 = vsel %vm181_vm1, %v1880_v23, %v1881_v22  ;;  %v2653_v1 = vsel %vm181_vm1, %v1881_v22, %v1880_v23 }
 0x37d   : > { %v1922_v24 = vpack.i.bf16 %v2649_v0, %v2653_v1 }
 0x381   : > { %v1889_v25 = vpop.permute.xlu2 %1888 }
 0x382   : > { %v1891_v54 = vunpack.i.h.bf16 %v1889_v25  ;;  %v1890_v55 = vunpack.i.l.bf16 %v1889_v25 }
 0x384   : > { %v604_v7 = vsel %vm211_vm6, %v1891_v54, %v1890_v55  ;;  %v603_v8 = vsel %vm211_vm6, %v1890_v55, %v1891_v54 }
 0x391   : > { %v1894_v28 = vpop.permute.xlu0 %1893 }
 0x392   : > { %v1874_v13 = vpop.permute.xlu1 %1873  ;;  %v1896_v5 = vunpack.i.h.bf16 %v1894_v28  ;;  %v1895_v6 = vunpack.i.l.bf16 %v1894_v28 }
 0x393   : > { %v1876_v16 = vunpack.i.h.bf16 %v1874_v13  ;;  %v1875_v17 = vunpack.i.l.bf16 %v1874_v13 }
 0x394   : > { %v584_v22 = vsel %vm188_vm2, %v1896_v5, %v1895_v6  ;;  %v583_v23 = vsel %vm188_vm2, %v1895_v6, %v1896_v5 }
 0x395   : > { %v617_v19 = vsel %vm260_vm0, %v1875_v17, %v1876_v16  ;;  %v618_v20 = vsel %vm260_vm0, %v1876_v16, %v1875_v17 }
 0x396   : > { %v1912_v21 = vpack.i.bf16 %v618_v20, %v617_v19 }
 0x398   : > { %1913 = vrot.lane.b32.xlu2 %v1912_v21, %s2325_s16  ;;  %1903 = vrot.lane.b32.xlu1 %v1912_v21, %s2326_s17 }
 0x399   : > { %1898 = vrot.lane.b32.xlu0 %v1912_v21, %s2328_s19 }
 0x39a   : > { %v1884_v27 = vpop.permute.xlu1 %1883 }
 0x39b   : > { %v1886_v44 = vunpack.i.h.bf16 %v1884_v27  ;;  %v1885_v45 = vunpack.i.l.bf16 %v1884_v27 }
 0x39d   : > { %v597_v60 = vsel %vm204_vm4, %v1885_v45, %v1886_v44  ;;  %v598_v61 = vsel %vm204_vm4, %v1886_v44, %v1885_v45 }
 0x39e   : > { %v605_v13 = vsel %vm2417_vm7, %v597_v60, %v604_v7  ;;  %v606_v16 = vsel %vm2421_vm8, %v598_v61, %v603_v8 }
 0x3a0   : > { %1923 = vrot.lane.b32.xlu2 %v1922_v24, %s2328_s19  ;;  %1908 = vrot.lane.b32.xlu1 %v1892_v12, %s2329_s20 }
 0x3a1   : > { %1918 = vrot.lane.b32.xlu0 %v1912_v21, %s2329_s20 }
 0x3a8   : > { %1938 = vrot.lane.b32.xlu2 %v1922_v24, %s2329_s20  ;;  %1933 = vrot.lane.b32.xlu1 %v1922_v24, %s2325_s16 }
 0x3a9   : > { %1928 = vrot.lane.b32.xlu0 %v1922_v24, %s2326_s17 }
 0x3f2   : > { %v1914_v31 = vpop.permute.xlu2 %1913 }
 0x3f3   : > { %v1916_v46 = vunpack.i.h.bf16 %v1914_v31  ;;  %v1915_v48 = vunpack.i.l.bf16 %v1914_v31 }
 0x3f5   : > { %v624_v58 = vsel %vm188_vm2, %v1916_v46, %v1915_v48  ;;  %v623_v59 = vsel %vm188_vm2, %v1915_v48, %v1916_v46 }
 0x3fa   : > { %v1924_v49 = vpop.permute.xlu2 %1923 }
 0x3fb   : > { %v1926_v9 = vunpack.i.h.bf16 %v1924_v49  ;;  %v1925_v12 = vunpack.i.l.bf16 %v1924_v49 }
 0x40a   : > { %v1904_v32 = vpop.permute.xlu1 %1903 }
 0x40b   : > { %v1906_v33 = vunpack.i.h.bf16 %v1904_v32  ;;  %v1905_v34 = vunpack.i.l.bf16 %v1904_v32  ;;  %v1899_v35 = vpop.permute.xlu0 %1898 }
 0x40c   : > { %v1901_v36 = vunpack.i.h.bf16 %v1899_v35  ;;  %v1900_v37 = vunpack.i.l.bf16 %v1899_v35 }
 0x40d   : > { %v644_v14 = vsel %vm211_vm6, %v1906_v33, %v1905_v34  ;;  %v643_v39 = vsel %vm211_vm6, %v1905_v34, %v1906_v33  ;;  %v563_v33 = vsel %vm204_vm4, %v1925_v12, %v1926_v9  ;;  %v564_v34 = vsel %vm204_vm4, %v1926_v9, %v1925_v12 }
 0x40e   : > { %v637_v40 = vsel %vm204_vm4, %v1900_v37, %v1901_v36  ;;  %v638_v41 = vsel %vm204_vm4, %v1901_v36, %v1900_v37 }
 0x40f   : > { %v645_v42 = vsel %vm2417_vm7, %v637_v40, %v644_v14  ;;  %v646_v43 = vsel %vm2421_vm8, %v638_v41, %v643_v39 }
 0x410   : > { %683 = vmatpush.msrb.mxu0 %v645_v42  ;;  %703 = vmatpush.msrb.mxu1 %v646_v43  ;;  %v1696_v43 = vld [vmem:[%s3342_s1 + $0x10] sm:$0xff] }
 0x412   : > { %684 = vmatpush.msrb.mxu0 %v617_v19  ;;  %704 = vmatpush.msrb.mxu1 %v618_v20  ;;  %v1909_v52 = vpop.permute.xlu1 %1908  ;;  %v1939_v20 = vpop.permute.xlu2 %1938 }
 0x413   : > { %v1919_v53 = vpop.permute.xlu0 %1918  ;;  %v1911_v62 = vunpack.i.h.bf16 %v1909_v52  ;;  %v1910_v63 = vunpack.i.l.bf16 %v1909_v52  ;;  %v1941_v35 = vunpack.i.h.bf16 %v1939_v20  ;;  %v1940_v36 = vunpack.i.l.bf16 %v1939_v20 }
 0x414   : > { %v1921_v56 = vunpack.i.h.bf16 %v1919_v53  ;;  %v1920_v57 = vunpack.i.l.bf16 %v1919_v53 }
 0x415   : > { %v589_v18 = vsel %vm195_vm3, %v1910_v63, %v1911_v62  ;;  %v590_v19 = vsel %vm195_vm3, %v1911_v62, %v1910_v63  ;;  %v555_v41 = vsel %vm195_vm3, %v1940_v36, %v1941_v35  ;;  %v556_v42 = vsel %vm195_vm3, %v1941_v35, %v1940_v36 }
 0x416   : > { %v629_v2 = vsel %vm195_vm3, %v1920_v57, %v1921_v56  ;;  %v630_v3 = vsel %vm195_vm3, %v1921_v56, %v1920_v57  ;;  %v591_v31 = vsel %vm2412_vm5, %v584_v22, %v589_v18  ;;  %v592_v32 = vsel %vm2433_vm9, %v583_v23, %v590_v19 }
 0x417   : > { %v631_v51 = vsel %vm2412_vm5, %v624_v58, %v629_v2  ;;  %v632_v50 = vsel %vm2433_vm9, %v623_v59, %v630_v3 }
 0x418   : > { %685 = vmatpush.msrb.mxu0 %v631_v51  ;;  %705 = vmatpush.msrb.mxu1 %v632_v50 }
 0x41a   : > { %686 = vmatpush.msrb.mxu0 %v605_v13  ;;  %706 = vmatpush.msrb.mxu1 %v606_v16  ;;  %v1934_v17 = vpop.permute.xlu1 %1933 }
 0x41b   : > { %v1929_v21 = vpop.permute.xlu0 %1928  ;;  %v1936_v24 = vunpack.i.h.bf16 %v1934_v17  ;;  %v1935_v25 = vunpack.i.l.bf16 %v1934_v17 }
 0x41c   : > { %v1931_v27 = vunpack.i.h.bf16 %v1929_v21  ;;  %v1930_v28 = vunpack.i.l.bf16 %v1929_v21  ;;  %687 = vmatpush.msrb.mxu0 %v2629_v10  ;;  %707 = vmatpush.msrb.mxu1 %v2631_v11 }
 0x41d   : > { %v550_v39 = vsel %vm188_vm2, %v1936_v24, %v1935_v25  ;;  %v549_v40 = vsel %vm188_vm2, %v1935_v25, %v1936_v24 }
 0x41e   : > { %688 = vmatpush.msrb.mxu0 %v591_v31  ;;  %708 = vmatpush.msrb.mxu1 %v592_v32  ;;  %v570_v10 = vsel %vm211_vm6, %v1931_v27, %v1930_v28  ;;  %v569_v11 = vsel %vm211_vm6, %v1930_v28, %v1931_v27  ;;  %v557_v44 = vsel %vm2412_vm5, %v550_v39, %v555_v41 }
 0x41f   : > { %v571_v37 = vsel %vm2417_vm7, %v563_v33, %v570_v10  ;;  %v572_v14 = vsel %vm2421_vm8, %v564_v34, %v569_v11  ;;  %v558_v45 = vsel %vm2433_vm9, %v549_v40, %v556_v42 }
 0x420   : > { %689 = vmatpush.msrb.mxu0 %v571_v37  ;;  %709 = vmatpush.msrb.mxu1 %v572_v14 }
 0x422   : > { %690 = vmatpush.msrb.mxu0 %v2653_v1  ;;  %710 = vmatpush.msrb.mxu1 %v2649_v0 }
 0x424   : > { %691 = vmatpush.msrb.mxu0 %v557_v44  ;;  %711 = vmatpush.msrb.mxu1 %v558_v45 }
 0x425   : > { %1697 = vmatmul.msk.f32.vlgmr.msrb.gmra.mxu0 %vm316_vm10, %v1696_v43  ;;  %1698 = vmatmul.msk.f32.vlgmr.msrb.gmra.mxu1 %vm316_vm10, %v1696_v43 }
 0x4a2   : > { %v693_v0 = vpop.f32.mrf.mxu0  ;;  %v713_v1 = vpop.f32.mrf.mxu1 }
 0x4a3   : > { %v716_v46 = vadd.f32 %v693_v0, %v2514_v15  ;;  %v717_v48 = vadd.f32 %v713_v1, %v2516_v38 }
 0x4a5   : > { %2296 = vtanh.f32 %v716_v46 }
 0x4a6   : > { %2298 = vtanh.f32 %v717_v48 }
 0x4ab   : > { %v2746_v49 = vpop.eup %2296 }
 0x4ac   : > { %v2748_v52 = vpop.eup %2298 }
 0x4ad   : > { %v1962_v53 = vpack.i.bf16 %v2748_v52, %v2746_v49 }
 0x4af   : > { %1963 = vrot.lane.b32.xlu2 %v1962_v53, %s2325_s16  ;;  %1948 = vrot.lane.b32.xlu1 %v1962_v53, %s2327_s18 }
 0x4b0   : > { %1943 = vrot.lane.b32.xlu0 %v1962_v53, %s2324_s15 }
 0x4b7   : > { %1958 = vrot.lane.b32.xlu1 %v1962_v53, %s2326_s17 }
 0x4b8   : > { %1953 = vrot.lane.b32.xlu0 %v1962_v53, %s2328_s19 }
 0x509   : > { %v2780_v2 = vpop.permute.xlu2 %1963 }
 0x50a   : > { %v1966_v40 = vunpack.i.h.bf16 %v2780_v2  ;;  %v1965_v41 = vunpack.i.l.bf16 %v2780_v2 }
 0x521   : > { %v1949_v55 = vpop.permute.xlu1 %1948 }
 0x522   : > { %v1944_v15 = vpop.permute.xlu0 %1943  ;;  %v1951_v59 = vunpack.i.h.bf16 %v1949_v55  ;;  %v1950_v60 = vunpack.i.l.bf16 %v1949_v55 }
 0x523   : > { %v1946_v38 = vunpack.i.h.bf16 %v1944_v15  ;;  %v1945_v54 = vunpack.i.l.bf16 %v1944_v15 }
 0x524   : > { %v2766_v61 = vsel %vm181_vm1, %v1950_v60, %v1951_v59  ;;  %v2770_v62 = vsel %vm181_vm1, %v1951_v59, %v1950_v60 }
 0x525   : > { %v798_v56 = vsel %vm260_vm0, %v1945_v54, %v1946_v38  ;;  %v799_v57 = vsel %vm260_vm0, %v1946_v38, %v1945_v54  ;;  %v1992_v63 = vpack.i.bf16 %v2766_v61, %v2770_v62 }
 0x526   : > { %v1982_v58 = vpack.i.bf16 %v799_v57, %v798_v56 }
 0x528   : > { %1983 = vrot.lane.b32.xlu1 %v1982_v58, %s2325_s16  ;;  %1973 = vrot.lane.b32.xlu0 %v1982_v58, %s2326_s17 }
 0x529   : > { %1968 = vrot.lane.b32.xlu2 %v1982_v58, %s2328_s19  ;;  %v1959_v5 = vpop.permute.xlu1 %1958 }
 0x52a   : > { %v1954_v6 = vpop.permute.xlu0 %1953  ;;  %v1961_v8 = vunpack.i.h.bf16 %v1959_v5  ;;  %v1960_v9 = vunpack.i.l.bf16 %v1959_v5 }
 0x52b   : > { %v1956_v20 = vunpack.i.h.bf16 %v1954_v6  ;;  %v1955_v21 = vunpack.i.l.bf16 %v1954_v6 }
 0x52c   : > { %v785_v36 = vsel %vm211_vm6, %v1961_v8, %v1960_v9  ;;  %v784_v10 = vsel %vm211_vm6, %v1960_v9, %v1961_v8 }
 0x52d   : > { %v778_v35 = vsel %vm204_vm4, %v1955_v21, %v1956_v20  ;;  %v779_v39 = vsel %vm204_vm4, %v1956_v20, %v1955_v21 }
 0x52e   : > { %v787_v15 = vsel %vm2421_vm8, %v779_v39, %v784_v10 }
 0x530   : > { %1993 = vrot.lane.b32.xlu1 %v1992_v63, %s2328_s19  ;;  %1978 = vrot.lane.b32.xlu0 %v1962_v53, %s2329_s20  ;;  %v786_v53 = vsel %vm2417_vm7, %v778_v35, %v785_v36 }
 0x531   : > { %1988 = vrot.lane.b32.xlu2 %v1982_v58, %s2329_s20  ;;  %v764_v58 = vsel %vm188_vm2, %v1965_v41, %v1966_v40 }
 0x538   : > { %2008 = vrot.lane.b32.xlu1 %v1992_v63, %s2329_s20  ;;  %2003 = vrot.lane.b32.xlu0 %v1992_v63, %s2325_s16 }
 0x539   : > { %1998 = vrot.lane.b32.xlu2 %v1992_v63, %s2326_s17 }
 0x583   : > { %v1969_v3 = vpop.permute.xlu2 %1968 }
 0x584   : > { %v1971_v50 = vunpack.i.h.bf16 %v1969_v3  ;;  %v1970_v7 = vunpack.i.l.bf16 %v1969_v3 }
 0x586   : > { %v818_v22 = vsel %vm204_vm4, %v1970_v7, %v1971_v50  ;;  %v819_v23 = vsel %vm204_vm4, %v1971_v50, %v1970_v7 }
 0x58b   : > { %v1989_v51 = vpop.permute.xlu2 %1988 }
 0x58c   : > { %v1991_v24 = vunpack.i.h.bf16 %v1989_v51  ;;  %v1990_v25 = vunpack.i.l.bf16 %v1989_v51 }
 0x58e   : > { %v810_v37 = vsel %vm195_vm3, %v1990_v25, %v1991_v24  ;;  %v811_v14 = vsel %vm195_vm3, %v1991_v24, %v1990_v25 }
 0x593   : > { %v1999_v11 = vpop.permute.xlu2 %1998 }
 0x594   : > { %v2001_v38 = vunpack.i.h.bf16 %v1999_v11  ;;  %v2000_v54 = vunpack.i.l.bf16 %v1999_v11 }
 0x596   : > { %v751_v3 = vsel %vm211_vm6, %v2001_v38, %v2000_v54  ;;  %v750_v5 = vsel %vm211_vm6, %v2000_v54, %v2001_v38 }
 0x59a   : > { %v1984_v12 = vpop.permute.xlu1 %1983  ;;  %v1974_v13 = vpop.permute.xlu0 %1973 }
 0x59b   : > { %v1986_v16 = vunpack.i.h.bf16 %v1984_v12  ;;  %v1985_v17 = vunpack.i.l.bf16 %v1984_v12  ;;  %v1976_v18 = vunpack.i.h.bf16 %v1974_v13  ;;  %v1975_v19 = vunpack.i.l.bf16 %v1974_v13 }
 0x59d   : > { %v825_v27 = vsel %vm211_vm6, %v1976_v18, %v1975_v19  ;;  %v824_v28 = vsel %vm211_vm6, %v1975_v19, %v1976_v18  ;;  %v805_v33 = vsel %vm188_vm2, %v1986_v16, %v1985_v17  ;;  %v804_v34 = vsel %vm188_vm2, %v1985_v17, %v1986_v16  ;;  %v1699_v19 = vld [vmem:[%s3342_s1 + $0x18] sm:$0xff] }
 0x59e   : > { %v826_v31 = vsel %vm2417_vm7, %v818_v22, %v825_v27  ;;  %v827_v32 = vsel %vm2421_vm8, %v819_v23, %v824_v28  ;;  %v812_v44 = vsel %vm2412_vm5, %v805_v33, %v810_v37  ;;  %v813_v45 = vsel %vm2433_vm9, %v804_v34, %v811_v14 }
 0x59f   : > { %864 = vmatpush.msrb.mxu2 %v826_v31  ;;  %884 = vmatpush.msrb.mxu3 %v827_v32 }
 0x5a1   : > { %865 = vmatpush.msrb.mxu2 %v798_v56  ;;  %885 = vmatpush.msrb.mxu3 %v799_v57  ;;  %v765_v57 = vsel %vm188_vm2, %v1966_v40, %v1965_v41 }
 0x5a2   : > { %v1994_v42 = vpop.permute.xlu1 %1993  ;;  %v1979_v43 = vpop.permute.xlu0 %1978 }
 0x5a3   : > { %v1996_v0 = vunpack.i.h.bf16 %v1994_v42  ;;  %v1995_v1 = vunpack.i.l.bf16 %v1994_v42  ;;  %v1981_v46 = vunpack.i.h.bf16 %v1979_v43  ;;  %v1980_v48 = vunpack.i.l.bf16 %v1979_v43  ;;  %866 = vmatpush.msrb.mxu2 %v812_v44  ;;  %886 = vmatpush.msrb.mxu3 %v813_v45 }
 0x5a5   : > { %867 = vmatpush.msrb.mxu2 %v786_v53  ;;  %887 = vmatpush.msrb.mxu3 %v787_v15  ;;  %v770_v55 = vsel %vm195_vm3, %v1980_v48, %v1981_v46  ;;  %v771_v56 = vsel %vm195_vm3, %v1981_v46, %v1980_v48  ;;  %v744_v59 = vsel %vm204_vm4, %v1995_v1, %v1996_v0 }
 0x5a6   : > { %v745_v60 = vsel %vm204_vm4, %v1996_v0, %v1995_v1  ;;  %v772_v63 = vsel %vm2412_vm5, %v765_v57, %v770_v55  ;;  %v773_v2 = vsel %vm2433_vm9, %v764_v58, %v771_v56  ;;  %v752_v50 = vsel %vm2417_vm7, %v744_v59, %v751_v3 }
 0x5a7   : > { %868 = vmatpush.msrb.mxu2 %v2746_v49  ;;  %888 = vmatpush.msrb.mxu3 %v2748_v52  ;;  %v753_v7 = vsel %vm2421_vm8, %v745_v60, %v750_v5 }
 0x5a9   : > { %869 = vmatpush.msrb.mxu2 %v772_v63  ;;  %889 = vmatpush.msrb.mxu3 %v773_v2 }
 0x5aa   : > { %v2009_v6 = vpop.permute.xlu1 %2008  ;;  %v2004_v51 = vpop.permute.xlu0 %2003 }
 0x5ab   : > { %v2011_v8 = vunpack.i.h.bf16 %v2009_v6  ;;  %v2010_v9 = vunpack.i.l.bf16 %v2009_v6  ;;  %v2006_v12 = vunpack.i.h.bf16 %v2004_v51  ;;  %v2005_v13 = vunpack.i.l.bf16 %v2004_v51  ;;  %870 = vmatpush.msrb.mxu2 %v752_v50  ;;  %890 = vmatpush.msrb.mxu3 %v753_v7 }
 0x5ad   : > { %871 = vmatpush.msrb.mxu2 %v2770_v62  ;;  %891 = vmatpush.msrb.mxu3 %v2766_v61  ;;  %v731_v16 = vsel %vm188_vm2, %v2006_v12, %v2005_v13  ;;  %v736_v17 = vsel %vm195_vm3, %v2010_v9, %v2011_v8  ;;  %v730_v18 = vsel %vm188_vm2, %v2005_v13, %v2006_v12 }
 0x5ae   : > { %v738_v20 = vsel %vm2412_vm5, %v731_v16, %v736_v17  ;;  %v737_v62 = vsel %vm195_vm3, %v2011_v8, %v2010_v9 }
 0x5af   : > { %872 = vmatpush.msrb.mxu2 %v738_v20  ;;  %v739_v61 = vsel %vm2433_vm9, %v730_v18, %v737_v62 }
 0x5b0   : > { %892 = vmatpush.msrb.mxu3 %v739_v61  ;;  %1700 = vmatmul.msk.f32.vlgmr.msrb.gmra.mxu2 %vm316_vm10, %v1699_v19 }
 0x5b1   : > { %1701 = vmatmul.msk.f32.vlgmr.msrb.gmra.mxu3 %vm316_vm10, %v1699_v19 }
 0x633   : > { %v874_v21 = vpop.f32.mrf.mxu2 }
 0x634   : > { %2300 = vtanh.f32 %v874_v21  ;;  %v894_v22 = vpop.f32.mrf.mxu3 }
 0x635   : > { %2302 = vtanh.f32 %v894_v22 }
 0x63a   : > { %v2865_v23 = vpop.eup %2300 }
 0x63b   : > { %v2867_v24 = vpop.eup %2302 }
 0x63c   : > { %v2032_v25 = vpack.i.bf16 %v2867_v24, %v2865_v23 }
 0x63e   : > { %2033 = vrot.lane.b32.xlu1 %v2032_v25, %s2325_s16  ;;  %2018 = vrot.lane.b32.xlu0 %v2032_v25, %s2327_s18 }
 0x63f   : > { %2013 = vrot.lane.b32.xlu2 %v2032_v25, %s2324_s15 }
 0x646   : > { %2028 = vrot.lane.b32.xlu0 %v2032_v25, %s2326_s17 }
 0x647   : > { %2023 = vrot.lane.b32.xlu2 %v2032_v25, %s2328_s19 }
 0x699   : > { %v2014_v27 = vpop.permute.xlu2 %2013 }
 0x69a   : > { %v2016_v28 = vunpack.i.h.bf16 %v2014_v27  ;;  %v2015_v31 = vunpack.i.l.bf16 %v2014_v27 }
 0x69c   : > { %v977_v32 = vsel %vm260_vm0, %v2015_v31, %v2016_v28  ;;  %v978_v33 = vsel %vm260_vm0, %v2016_v28, %v2015_v31 }
 0x69d   : > { %v2052_v34 = vpack.i.bf16 %v978_v33, %v977_v32 }
 0x69f   : > { %2053 = vrot.lane.b32.xlu0 %v2052_v34, %s2325_s16  ;;  %2043 = vrot.lane.b32.xlu2 %v2052_v34, %s2326_s17 }
 0x6a0   : > { %2038 = vrot.lane.b32.xlu1 %v2052_v34, %s2328_s19 }
 0x6a1   : > { %v2024_v39 = vpop.permute.xlu2 %2023 }
 0x6a2   : > { %v2026_v2 = vunpack.i.h.bf16 %v2024_v39  ;;  %v2025_v3 = vunpack.i.l.bf16 %v2024_v39 }
 0x6a4   : > { %v957_v62 = vsel %vm204_vm4, %v2025_v3, %v2026_v2  ;;  %v958_v61 = vsel %vm204_vm4, %v2026_v2, %v2025_v3 }
 0x6a7   : > { %2048 = vrot.lane.b32.xlu2 %v2032_v25, %s2329_s20 }
 0x6a8   : > { %2058 = vrot.lane.b32.xlu1 %v2052_v34, %s2329_s20 }
 0x6b0   : > { %v2019_v35 = vpop.permute.xlu0 %2018  ;;  %v2034_v40 = vpop.permute.xlu1 %2033 }
 0x6b1   : > { %v2021_v36 = vunpack.i.h.bf16 %v2019_v35  ;;  %v2020_v10 = vunpack.i.l.bf16 %v2019_v35  ;;  %v2036_v19 = vunpack.i.h.bf16 %v2034_v40  ;;  %v2035_v20 = vunpack.i.l.bf16 %v2034_v40 }
 0x6b3   : > { %v2887_v11 = vsel %vm181_vm1, %v2020_v10, %v2021_v36  ;;  %v2891_v37 = vsel %vm181_vm1, %v2021_v36, %v2020_v10  ;;  %v944_v28 = vsel %vm188_vm2, %v2036_v19, %v2035_v20  ;;  %v943_v31 = vsel %vm188_vm2, %v2035_v20, %v2036_v19 }
 0x6b4   : > { %v2062_v14 = vpack.i.bf16 %v2887_v11, %v2891_v37 }
 0x6b6   : > { %2063 = vrot.lane.b32.xlu0 %v2062_v14, %s2328_s19  ;;  %2073 = vrot.lane.b32.xlu2 %v2062_v14, %s2325_s16 }
 0x6b7   : > { %2068 = vrot.lane.b32.xlu1 %v2062_v14, %s2326_s17 }
 0x6b8   : > { %v2029_v41 = vpop.permute.xlu0 %2028 }
 0x6b9   : > { %v2031_v56 = vunpack.i.h.bf16 %v2029_v41  ;;  %v2030_v57 = vunpack.i.l.bf16 %v2029_v41 }
 0x6bb   : > { %v964_v7 = vsel %vm211_vm6, %v2031_v56, %v2030_v57  ;;  %v963_v8 = vsel %vm211_vm6, %v2030_v57, %v2031_v56 }
 0x6bc   : > { %v965_v21 = vsel %vm2417_vm7, %v957_v62, %v964_v7  ;;  %v966_v22 = vsel %vm2421_vm8, %v958_v61, %v963_v8 }
 0x6be   : > { %2078 = vrot.lane.b32.xlu0 %v2062_v14, %s2329_s20 }
 0x6f9   : > { %v2044_v42 = vpop.permute.xlu2 %2043 }
 0x6fa   : > { %v2046_v43 = vunpack.i.h.bf16 %v2044_v42  ;;  %v2045_v44 = vunpack.i.l.bf16 %v2044_v42 }
 0x6fc   : > { %v1004_v48 = vsel %vm211_vm6, %v2046_v43, %v2045_v44  ;;  %v1003_v15 = vsel %vm211_vm6, %v2045_v44, %v2046_v43 }
 0x701   : > { %v2049_v58 = vpop.permute.xlu2 %2048 }
 0x702   : > { %v2051_v51 = vunpack.i.h.bf16 %v2049_v58  ;;  %v2050_v50 = vunpack.i.l.bf16 %v2049_v58 }
 0x704   : > { %v949_v25 = vsel %vm195_vm3, %v2050_v50, %v2051_v51  ;;  %v950_v27 = vsel %vm195_vm3, %v2051_v51, %v2050_v50 }
 0x710   : > { %v2074_v40 = vpop.permute.xlu2 %2073 }
 0x711   : > { %v2054_v38 = vpop.permute.xlu0 %2053 }
 0x712   : > { %v2039_v45 = vpop.permute.xlu1 %2038  ;;  %v2056_v59 = vunpack.i.h.bf16 %v2054_v38  ;;  %v2055_v60 = vunpack.i.l.bf16 %v2054_v38 }
 0x713   : > { %v2041_v0 = vunpack.i.h.bf16 %v2039_v45  ;;  %v2040_v1 = vunpack.i.l.bf16 %v2039_v45  ;;  %v2076_v45 = vunpack.i.h.bf16 %v2074_v40 }
 0x714   : > { %v984_v9 = vsel %vm188_vm2, %v2056_v59, %v2055_v60  ;;  %v983_v13 = vsel %vm188_vm2, %v2055_v60, %v2056_v59 }
 0x715   : > { %v997_v46 = vsel %vm204_vm4, %v2040_v1, %v2041_v0  ;;  %v998_v53 = vsel %vm204_vm4, %v2041_v0, %v2040_v1  ;;  %v2075_v0 = vunpack.i.l.bf16 %v2074_v40 }
 0x716   : > { %v1005_v54 = vsel %vm2417_vm7, %v997_v46, %v1004_v48  ;;  %v1006_v55 = vsel %vm2421_vm8, %v998_v53, %v1003_v15 }
 0x717   : > { %1043 = vmatpush.msra.mxu0 %v1005_v54  ;;  %1063 = vmatpush.msra.mxu1 %v1006_v55  ;;  %v910_v53 = vsel %vm188_vm2, %v2076_v45, %v2075_v0  ;;  %v909_v38 = vsel %vm188_vm2, %v2075_v0, %v2076_v45 }
 0x719   : > { %1044 = vmatpush.msra.mxu0 %v977_v32  ;;  %1064 = vmatpush.msra.mxu1 %v978_v33  ;;  %v951_v32 = vsel %vm2412_vm5, %v944_v28, %v949_v25  ;;  %v952_v33 = vsel %vm2433_vm9, %v943_v31, %v950_v27 }
 0x71a   : > { %v2059_v63 = vpop.permute.xlu1 %2058 }
 0x71b   : > { %v2061_v5 = vunpack.i.h.bf16 %v2059_v63  ;;  %v2060_v6 = vunpack.i.l.bf16 %v2059_v63 }
 0x71d   : > { %v989_v12 = vsel %vm195_vm3, %v2060_v6, %v2061_v5  ;;  %v990_v16 = vsel %vm195_vm3, %v2061_v5, %v2060_v6 }
 0x71e   : > { %v991_v17 = vsel %vm2412_vm5, %v984_v9, %v989_v12  ;;  %v992_v18 = vsel %vm2433_vm9, %v983_v13, %v990_v16 }
 0x71f   : > { %1045 = vmatpush.msra.mxu0 %v991_v17  ;;  %1065 = vmatpush.msra.mxu1 %v992_v18 }
 0x721   : > { %1046 = vmatpush.msra.mxu0 %v965_v21  ;;  %1066 = vmatpush.msra.mxu1 %v966_v22 }
 0x723   : > { %1047 = vmatpush.msra.mxu0 %v2865_v23  ;;  %1067 = vmatpush.msra.mxu1 %v2867_v24 }
 0x725   : > { %1048 = vmatpush.msra.mxu0 %v951_v32  ;;  %1068 = vmatpush.msra.mxu1 %v952_v33 }
 0x728   : > { %v2064_v34 = vpop.permute.xlu0 %2063 }
 0x729   : > { %v2066_v35 = vunpack.i.h.bf16 %v2064_v34  ;;  %v2065_v36 = vunpack.i.l.bf16 %v2064_v34  ;;  %v2069_v23 = vpop.permute.xlu1 %2068 }
 0x72a   : > { %v2071_v10 = vunpack.i.h.bf16 %v2069_v23  ;;  %v2070_v24 = vunpack.i.l.bf16 %v2069_v23 }
 0x72b   : > { %v923_v14 = vsel %vm204_vm4, %v2065_v36, %v2066_v35  ;;  %v924_v39 = vsel %vm204_vm4, %v2066_v35, %v2065_v36 }
 0x72c   : > { %v930_v41 = vsel %vm211_vm6, %v2071_v10, %v2070_v24  ;;  %v929_v42 = vsel %vm211_vm6, %v2070_v24, %v2071_v10 }
 0x72d   : > { %v931_v43 = vsel %vm2417_vm7, %v923_v14, %v930_v41  ;;  %v932_v44 = vsel %vm2421_vm8, %v924_v39, %v929_v42 }
 0x72e   : > { %1049 = vmatpush.msra.mxu0 %v931_v43  ;;  %1069 = vmatpush.msra.mxu1 %v932_v44 }
 0x730   : > { %1050 = vmatpush.msra.mxu0 %v2891_v37  ;;  %1070 = vmatpush.msra.mxu1 %v2887_v11  ;;  %v2079_v1 = vpop.permute.xlu0 %2078  ;;  %v1702_v37 = vld [vmem:[%s3342_s1 + $0x20] sm:$0xff] }
 0x731   : > { %v2081_v46 = vunpack.i.h.bf16 %v2079_v1  ;;  %v2080_v48 = vunpack.i.l.bf16 %v2079_v1 }
 0x733   : > { %v915_v15 = vsel %vm195_vm3, %v2080_v48, %v2081_v46  ;;  %v916_v54 = vsel %vm195_vm3, %v2081_v46, %v2080_v48 }
 0x734   : > { %v917_v11 = vsel %vm2412_vm5, %v910_v53, %v915_v15  ;;  %v918_v55 = vsel %vm2433_vm9, %v909_v38, %v916_v54 }
 0x735   : > { %1051 = vmatpush.msra.mxu0 %v917_v11  ;;  %1071 = vmatpush.msra.mxu1 %v918_v55 }
 0x736   : > { %1703 = vmatmul.msk.f32.vlgmr.msra.gmra.mxu0 %vm316_vm10, %v1702_v37  ;;  %1704 = vmatmul.msk.f32.vlgmr.msra.gmra.mxu1 %vm316_vm10, %v1702_v37 }
 0x7b3   : > { %v1053_v56 = vpop.f32.mrf.mxu0  ;;  %v1073_v57 = vpop.f32.mrf.mxu1 }
 0x7b4   : > { %v1076_v58 = vadd.f32 %v2746_v49, %v1053_v56  ;;  %v1077_v59 = vadd.f32 %v2748_v52, %v1073_v57 }
 0x7b6   : > { %2304 = vtanh.f32 %v1076_v58 }
 0x7b7   : > { %2306 = vtanh.f32 %v1077_v59 }
 0x7bc   : > { %v2982_v60 = vpop.eup %2304 }
 0x7bd   : > { %v2984_v63 = vpop.eup %2306 }
 0x7be   : > { %v2102_v2 = vpack.i.bf16 %v2984_v63, %v2982_v60 }
 0x7c0   : > { %2103 = vrot.lane.b32.xlu0 %v2102_v2, %s2325_s16  ;;  %2088 = vrot.lane.b32.xlu2 %v2102_v2, %s2327_s18 }
 0x7c1   : > { %2083 = vrot.lane.b32.xlu1 %v2102_v2, %s2324_s15 }
 0x7c8   : > { %2098 = vrot.lane.b32.xlu2 %v2102_v2, %s2326_s17 }
 0x7c9   : > { %2093 = vrot.lane.b32.xlu1 %v2102_v2, %s2328_s19 }
 0x81a   : > { %v2089_v5 = vpop.permute.xlu2 %2088 }
 0x81b   : > { %v2091_v7 = vunpack.i.h.bf16 %v2089_v5  ;;  %v2090_v8 = vunpack.i.l.bf16 %v2089_v5 }
 0x81d   : > { %v3002_v9 = vsel %vm181_vm1, %v2090_v8, %v2091_v7  ;;  %v3006_v12 = vsel %vm181_vm1, %v2091_v7, %v2090_v8 }
 0x81e   : > { %v2132_v13 = vpack.i.bf16 %v3002_v9, %v3006_v12 }
 0x822   : > { %v2099_v16 = vpop.permute.xlu2 %2098 }
 0x823   : > { %v2101_v40 = vunpack.i.h.bf16 %v2099_v16  ;;  %v2100_v41 = vunpack.i.l.bf16 %v2099_v16 }
 0x825   : > { %v1145_v55 = vsel %vm211_vm6, %v2101_v40, %v2100_v41  ;;  %v1144_v56 = vsel %vm211_vm6, %v2100_v41, %v2101_v40 }
 0x832   : > { %v2104_v18 = vpop.permute.xlu0 %2103 }
 0x833   : > { %v2084_v49 = vpop.permute.xlu1 %2083  ;;  %v2106_v38 = vunpack.i.h.bf16 %v2104_v18  ;;  %v2105_v54 = vunpack.i.l.bf16 %v2104_v18 }
 0x834   : > { %v2086_v52 = vunpack.i.h.bf16 %v2084_v49  ;;  %v2085_v3 = vunpack.i.l.bf16 %v2084_v49 }
 0x836   : > { %v1158_v6 = vsel %vm260_vm0, %v2085_v3, %v2086_v52  ;;  %v1159_v51 = vsel %vm260_vm0, %v2086_v52, %v2085_v3 }
 0x837   : > { %v2122_v50 = vpack.i.bf16 %v1159_v51, %v1158_v6 }
 0x839   : > { %2123 = vrot.lane.b32.xlu2 %v2122_v50, %s2325_s16  ;;  %2113 = vrot.lane.b32.xlu1 %v2122_v50, %s2326_s17 }
 0x83a   : > { %2108 = vrot.lane.b32.xlu0 %v2122_v50, %s2328_s19 }
 0x83b   : > { %v2094_v17 = vpop.permute.xlu1 %2093 }
 0x83c   : > { %v2096_v35 = vunpack.i.h.bf16 %v2094_v17  ;;  %v2095_v36 = vunpack.i.l.bf16 %v2094_v17 }
 0x83e   : > { %v1138_v0 = vsel %vm204_vm4, %v2095_v36, %v2096_v35  ;;  %v1139_v1 = vsel %vm204_vm4, %v2096_v35, %v2095_v36 }
 0x83f   : > { %v1146_v59 = vsel %vm2417_vm7, %v1138_v0, %v1145_v55 }
 0x841   : > { %2133 = vrot.lane.b32.xlu2 %v2132_v13, %s2328_s19  ;;  %2118 = vrot.lane.b32.xlu1 %v2102_v2, %s2329_s20  ;;  %v1147_v2 = vsel %vm2421_vm8, %v1139_v1, %v1144_v56 }
 0x842   : > { %2128 = vrot.lane.b32.xlu0 %v2122_v50, %s2329_s20  ;;  %v1124_v50 = vsel %vm188_vm2, %v2105_v54, %v2106_v38 }
 0x849   : > { %2148 = vrot.lane.b32.xlu2 %v2132_v13, %s2329_s20  ;;  %2143 = vrot.lane.b32.xlu1 %v2132_v13, %s2325_s16 }
 0x84a   : > { %2138 = vrot.lane.b32.xlu0 %v2132_v13, %s2326_s17 }
 0x893   : > { %v2124_v19 = vpop.permute.xlu2 %2123 }
 0x894   : > { %v2126_v23 = vunpack.i.h.bf16 %v2124_v19  ;;  %v2125_v10 = vunpack.i.l.bf16 %v2124_v19 }
 0x896   : > { %v1165_v44 = vsel %vm188_vm2, %v2126_v23, %v2125_v10  ;;  %v1164_v45 = vsel %vm188_vm2, %v2125_v10, %v2126_v23 }
 0x89b   : > { %v2134_v24 = vpop.permute.xlu2 %2133 }
 0x89c   : > { %v2136_v57 = vunpack.i.h.bf16 %v2134_v24  ;;  %v2135_v58 = vunpack.i.l.bf16 %v2134_v24 }
 0x89e   : > { %v1104_v19 = vsel %vm204_vm4, %v2135_v58, %v2136_v57 }
 0x8a3   : > { %v2149_v5 = vpop.permute.xlu2 %2148 }
 0x8ab   : > { %v2114_v20 = vpop.permute.xlu1 %2113 }
 0x8ac   : > { %v2116_v62 = vunpack.i.h.bf16 %v2114_v20  ;;  %v2115_v61 = vunpack.i.l.bf16 %v2114_v20  ;;  %v2109_v21 = vpop.permute.xlu0 %2108  ;;  %v1105_v20 = vsel %vm204_vm4, %v2136_v57, %v2135_v58 }
 0x8ad   : > { %v2111_v22 = vunpack.i.h.bf16 %v2109_v21  ;;  %v2110_v25 = vunpack.i.l.bf16 %v2109_v21 }
 0x8ae   : > { %v1185_v27 = vsel %vm211_vm6, %v2116_v62, %v2115_v61  ;;  %v1184_v28 = vsel %vm211_vm6, %v2115_v61, %v2116_v62  ;;  %v2151_v62 = vunpack.i.h.bf16 %v2149_v5  ;;  %v2150_v61 = vunpack.i.l.bf16 %v2149_v5 }
 0x8af   : > { %v1178_v31 = vsel %vm204_vm4, %v2110_v25, %v2111_v22  ;;  %v1179_v32 = vsel %vm204_vm4, %v2111_v22, %v2110_v25 }
 0x8b0   : > { %v1186_v33 = vsel %vm2417_vm7, %v1178_v31, %v1185_v27  ;;  %v1187_v34 = vsel %vm2421_vm8, %v1179_v32, %v1184_v28  ;;  %v1096_v32 = vsel %vm195_vm3, %v2150_v61, %v2151_v62 }
 0x8b1   : > { %1224 = vmatpush.msra.mxu2 %v1186_v33  ;;  %1244 = vmatpush.msra.mxu3 %v1187_v34  ;;  %v1097_v33 = vsel %vm195_vm3, %v2151_v62, %v2150_v61  ;;  %v1705_v34 = vld [vmem:[%s3342_s1 + $0x28] sm:$0xff] }
 0x8b3   : > { %1225 = vmatpush.msra.mxu2 %v1158_v6  ;;  %1245 = vmatpush.msra.mxu3 %v1159_v51  ;;  %v2119_v14 = vpop.permute.xlu1 %2118  ;;  %v1125_v51 = vsel %vm188_vm2, %v2106_v38, %v2105_v54 }
 0x8b4   : > { %v2129_v39 = vpop.permute.xlu0 %2128  ;;  %v2121_v46 = vunpack.i.h.bf16 %v2119_v14  ;;  %v2120_v48 = vunpack.i.l.bf16 %v2119_v14 }
 0x8b5   : > { %v2131_v42 = vunpack.i.h.bf16 %v2129_v39  ;;  %v2130_v43 = vunpack.i.l.bf16 %v2129_v39 }
 0x8b6   : > { %v1130_v52 = vsel %vm195_vm3, %v2120_v48, %v2121_v46  ;;  %v1131_v3 = vsel %vm195_vm3, %v2121_v46, %v2120_v48 }
 0x8b7   : > { %v1170_v53 = vsel %vm195_vm3, %v2130_v43, %v2131_v42  ;;  %v1171_v15 = vsel %vm195_vm3, %v2131_v42, %v2130_v43  ;;  %v1132_v17 = vsel %vm2412_vm5, %v1125_v51, %v1130_v52  ;;  %v1133_v18 = vsel %vm2433_vm9, %v1124_v50, %v1131_v3 }
 0x8b8   : > { %v1172_v37 = vsel %vm2412_vm5, %v1165_v44, %v1170_v53  ;;  %v1173_v11 = vsel %vm2433_vm9, %v1164_v45, %v1171_v15 }
 0x8b9   : > { %1226 = vmatpush.msra.mxu2 %v1172_v37  ;;  %1246 = vmatpush.msra.mxu3 %v1173_v11 }
 0x8bb   : > { %1227 = vmatpush.msra.mxu2 %v1146_v59  ;;  %1247 = vmatpush.msra.mxu3 %v1147_v2  ;;  %v2144_v49 = vpop.permute.xlu1 %2143 }
 0x8bc   : > { %v2139_v6 = vpop.permute.xlu0 %2138  ;;  %v2146_v7 = vunpack.i.h.bf16 %v2144_v49  ;;  %v2145_v8 = vunpack.i.l.bf16 %v2144_v49 }
 0x8bd   : > { %v2141_v13 = vunpack.i.h.bf16 %v2139_v6  ;;  %v2140_v16 = vunpack.i.l.bf16 %v2139_v6  ;;  %1228 = vmatpush.msra.mxu2 %v2982_v60  ;;  %1248 = vmatpush.msra.mxu3 %v2984_v63 }
 0x8be   : > { %v1091_v28 = vsel %vm188_vm2, %v2146_v7, %v2145_v8  ;;  %v1090_v31 = vsel %vm188_vm2, %v2145_v8, %v2146_v7 }
 0x8bf   : > { %1229 = vmatpush.msra.mxu2 %v1132_v17  ;;  %1249 = vmatpush.msra.mxu3 %v1133_v18  ;;  %v1111_v21 = vsel %vm211_vm6, %v2141_v13, %v2140_v16  ;;  %v1110_v22 = vsel %vm211_vm6, %v2140_v16, %v2141_v13  ;;  %v1098_v35 = vsel %vm2412_vm5, %v1091_v28, %v1096_v32 }
 0x8c0   : > { %v1112_v25 = vsel %vm2417_vm7, %v1104_v19, %v1111_v21  ;;  %v1113_v27 = vsel %vm2421_vm8, %v1105_v20, %v1110_v22  ;;  %v1099_v36 = vsel %vm2433_vm9, %v1090_v31, %v1097_v33 }
 0x8c1   : > { %1230 = vmatpush.msra.mxu2 %v1112_v25  ;;  %1250 = vmatpush.msra.mxu3 %v1113_v27 }
 0x8c3   : > { %1231 = vmatpush.msra.mxu2 %v3006_v12  ;;  %1251 = vmatpush.msra.mxu3 %v3002_v9 }
 0x8c5   : > { %1232 = vmatpush.msra.mxu2 %v1098_v35  ;;  %1252 = vmatpush.msra.mxu3 %v1099_v36 }
 0x8c6   : > { %1706 = vmatmul.msk.f32.vlgmr.msra.gmra.mxu2 %vm316_vm10, %v1705_v34  ;;  %1707 = vmatmul.msk.f32.vlgmr.msra.gmra.mxu3 %vm316_vm10, %v1705_v34 }
 0x949   : > { %v1234_v9 = vpop.f32.mrf.mxu2  ;;  %v1254_v12 = vpop.f32.mrf.mxu3 }
 0x94a   : > { %2308 = vtanh.f32 %v1234_v9 }
 0x94b   : > { %2310 = vtanh.f32 %v1254_v12 }
 0x950   : > { %v3097_v23 = vpop.eup %2308 }
 0x951   : > { %v3099_v10 = vpop.eup %2310 }
 0x952   : > { %v2172_v24 = vpack.i.bf16 %v3099_v10, %v3097_v23 }
 0x954   : > { %2173 = vrot.lane.b32.xlu2 %v2172_v24, %s2325_s16  ;;  %2158 = vrot.lane.b32.xlu1 %v2172_v24, %s2327_s18 }
 0x955   : > { %2153 = vrot.lane.b32.xlu0 %v2172_v24, %s2324_s15 }
 0x95c   : > { %2168 = vrot.lane.b32.xlu1 %v2172_v24, %s2326_s17 }
 0x95d   : > { %2163 = vrot.lane.b32.xlu0 %v2172_v24, %s2328_s19 }
 0x9ae   : > { %v3131_v53 = vpop.permute.xlu2 %2173 }
 0x9af   : > { %v2176_v31 = vunpack.i.h.bf16 %v3131_v53  ;;  %v2175_v32 = vunpack.i.l.bf16 %v3131_v53 }
 0x9c6   : > { %v2159_v41 = vpop.permute.xlu1 %2158 }
 0x9c7   : > { %v2154_v14 = vpop.permute.xlu0 %2153  ;;  %v2161_v45 = vunpack.i.h.bf16 %v2159_v41  ;;  %v2160_v0 = vunpack.i.l.bf16 %v2159_v41 }
 0x9c8   : > { %v2156_v39 = vunpack.i.h.bf16 %v2154_v14  ;;  %v2155_v40 = vunpack.i.l.bf16 %v2154_v14 }
 0x9c9   : > { %v3117_v1 = vsel %vm181_vm1, %v2160_v0, %v2161_v45  ;;  %v3121_v46 = vsel %vm181_vm1, %v2161_v45, %v2160_v0  ;;  %v1304_v45 = vsel %vm188_vm2, %v2176_v31, %v2175_v32  ;;  %v1303_v0 = vsel %vm188_vm2, %v2175_v32, %v2176_v31 }
 0x9ca   : > { %v1337_v42 = vsel %vm260_vm0, %v2155_v40, %v2156_v39  ;;  %v1338_v43 = vsel %vm260_vm0, %v2156_v39, %v2155_v40  ;;  %v2202_v48 = vpack.i.bf16 %v3117_v1, %v3121_v46 }
 0x9cb   : > { %v2192_v44 = vpack.i.bf16 %v1338_v43, %v1337_v42 }
 0x9cd   : > { %2193 = vrot.lane.b32.xlu1 %v2192_v44, %s2325_s16  ;;  %2183 = vrot.lane.b32.xlu0 %v2192_v44, %s2326_s17 }
 0x9ce   : > { %2178 = vrot.lane.b32.xlu2 %v2192_v44, %s2328_s19  ;;  %v2169_v38 = vpop.permute.xlu1 %2168 }
 0x9cf   : > { %v2164_v54 = vpop.permute.xlu0 %2163  ;;  %v2171_v56 = vunpack.i.h.bf16 %v2169_v38  ;;  %v2170_v57 = vunpack.i.l.bf16 %v2169_v38 }
 0x9d0   : > { %v2166_v5 = vunpack.i.h.bf16 %v2164_v54  ;;  %v2165_v6 = vunpack.i.l.bf16 %v2164_v54 }
 0x9d1   : > { %v1324_v61 = vsel %vm211_vm6, %v2171_v56, %v2170_v57  ;;  %v1323_v21 = vsel %vm211_vm6, %v2170_v57, %v2171_v56 }
 0x9d2   : > { %v1317_v62 = vsel %vm204_vm4, %v2165_v6, %v2166_v5  ;;  %v1318_v28 = vsel %vm204_vm4, %v2166_v5, %v2165_v6 }
 0x9d3   : > { %v1325_v39 = vsel %vm2417_vm7, %v1317_v62, %v1324_v61  ;;  %v1326_v40 = vsel %vm2421_vm8, %v1318_v28, %v1323_v21 }
 0x9d5   : > { %2203 = vrot.lane.b32.xlu1 %v2202_v48, %s2328_s19  ;;  %2188 = vrot.lane.b32.xlu0 %v2172_v24, %s2329_s20 }
 0x9d6   : > { %2198 = vrot.lane.b32.xlu2 %v2192_v44, %s2329_s20 }
 0x9dd   : > { %2218 = vrot.lane.b32.xlu1 %v2202_v48, %s2329_s20  ;;  %2213 = vrot.lane.b32.xlu0 %v2202_v48, %s2325_s16 }
 0x9de   : > { %2208 = vrot.lane.b32.xlu2 %v2202_v48, %s2326_s17 }
 0xa28   : > { %v2179_v15 = vpop.permute.xlu2 %2178 }
 0xa29   : > { %v2181_v11 = vunpack.i.h.bf16 %v2179_v15  ;;  %v2180_v55 = vunpack.i.l.bf16 %v2179_v15 }
 0xa2b   : > { %v1357_v51 = vsel %vm204_vm4, %v2180_v55, %v2181_v11  ;;  %v1358_v50 = vsel %vm204_vm4, %v2181_v11, %v2180_v55 }
 0xa30   : > { %v2199_v37 = vpop.permute.xlu2 %2198 }
 0xa31   : > { %v2201_v7 = vunpack.i.h.bf16 %v2199_v37  ;;  %v2200_v8 = vunpack.i.l.bf16 %v2199_v37 }
 0xa33   : > { %v1349_v25 = vsel %vm195_vm3, %v2200_v8, %v2201_v7  ;;  %v1350_v27 = vsel %vm195_vm3, %v2201_v7, %v2200_v8 }
 0xa38   : > { %v2209_v22 = vpop.permute.xlu2 %2208 }
 0xa39   : > { %v2211_v41 = vunpack.i.h.bf16 %v2209_v22 }
 0xa3f   : > { %v2194_v58 = vpop.permute.xlu1 %2193  ;;  %v2184_v59 = vpop.permute.xlu0 %2183 }
 0xa40   : > { %v2196_v2 = vunpack.i.h.bf16 %v2194_v58  ;;  %v2195_v49 = vunpack.i.l.bf16 %v2194_v58  ;;  %v2186_v52 = vunpack.i.h.bf16 %v2184_v59  ;;  %v2185_v3 = vunpack.i.l.bf16 %v2184_v59 }
 0xa42   : > { %v1364_v13 = vsel %vm211_vm6, %v2186_v52, %v2185_v3  ;;  %v1363_v16 = vsel %vm211_vm6, %v2185_v3, %v2186_v52  ;;  %v1344_v19 = vsel %vm188_vm2, %v2196_v2, %v2195_v49  ;;  %v1343_v20 = vsel %vm188_vm2, %v2195_v49, %v2196_v2  ;;  %v1708_v3 = vld [vmem:[%s3342_s1 + $0x30] sm:$0xff] }
 0xa43   : > { %v1365_v17 = vsel %vm2417_vm7, %v1357_v51, %v1364_v13  ;;  %v1366_v18 = vsel %vm2421_vm8, %v1358_v50, %v1363_v16  ;;  %v1351_v35 = vsel %vm2412_vm5, %v1344_v19, %v1349_v25  ;;  %v1352_v36 = vsel %vm2433_vm9, %v1343_v20, %v1350_v27 }
 0xa44   : > { %1403 = vmatpush.msrb.mxu0 %v1365_v17  ;;  %1423 = vmatpush.msrb.mxu1 %v1366_v18 }
 0xa46   : > { %1404 = vmatpush.msrb.mxu0 %v1337_v42  ;;  %1424 = vmatpush.msrb.mxu1 %v1338_v43  ;;  %v2210_v42 = vunpack.i.l.bf16 %v2209_v22 }
 0xa47   : > { %v2204_v33 = vpop.permute.xlu1 %2203  ;;  %v2189_v34 = vpop.permute.xlu0 %2188 }
 0xa48   : > { %v2206_v9 = vunpack.i.h.bf16 %v2204_v33  ;;  %v2205_v12 = vunpack.i.l.bf16 %v2204_v33  ;;  %v2191_v24 = vunpack.i.h.bf16 %v2189_v34  ;;  %v2190_v14 = vunpack.i.l.bf16 %v2189_v34  ;;  %1405 = vmatpush.msrb.mxu0 %v1351_v35  ;;  %1425 = vmatpush.msrb.mxu1 %v1352_v36 }
 0xa4a   : > { %1406 = vmatpush.msrb.mxu0 %v1325_v39  ;;  %1426 = vmatpush.msrb.mxu1 %v1326_v40  ;;  %v1309_v43 = vsel %vm195_vm3, %v2190_v14, %v2191_v24  ;;  %v1310_v44 = vsel %vm195_vm3, %v2191_v24, %v2190_v14  ;;  %v1283_v48 = vsel %vm204_vm4, %v2205_v12, %v2206_v9 }
 0xa4b   : > { %v1284_v53 = vsel %vm204_vm4, %v2206_v9, %v2205_v12  ;;  %v1311_v15 = vsel %vm2412_vm5, %v1304_v45, %v1309_v43  ;;  %v1312_v38 = vsel %vm2433_vm9, %v1303_v0, %v1310_v44 }
 0xa4c   : > { %1407 = vmatpush.msrb.mxu0 %v3097_v23  ;;  %1427 = vmatpush.msrb.mxu1 %v3099_v10  ;;  %v1290_v23 = vsel %vm211_vm6, %v2211_v41, %v2210_v42  ;;  %v1289_v10 = vsel %vm211_vm6, %v2210_v42, %v2211_v41 }
 0xa4d   : > { %v1291_v11 = vsel %vm2417_vm7, %v1283_v48, %v1290_v23  ;;  %v1292_v55 = vsel %vm2421_vm8, %v1284_v53, %v1289_v10 }
 0xa4e   : > { %1408 = vmatpush.msrb.mxu0 %v1311_v15  ;;  %1428 = vmatpush.msrb.mxu1 %v1312_v38 }
 0xa4f   : > { %v2219_v54 = vpop.permute.xlu1 %2218  ;;  %v2214_v37 = vpop.permute.xlu0 %2213 }
 0xa50   : > { %v2221_v56 = vunpack.i.h.bf16 %v2219_v54  ;;  %v2220_v57 = vunpack.i.l.bf16 %v2219_v54  ;;  %v2216_v58 = vunpack.i.h.bf16 %v2214_v37  ;;  %v2215_v59 = vunpack.i.l.bf16 %v2214_v37  ;;  %1409 = vmatpush.msrb.mxu0 %v1291_v11  ;;  %1429 = vmatpush.msrb.mxu1 %v1292_v55 }
 0xa52   : > { %1410 = vmatpush.msrb.mxu0 %v3121_v46  ;;  %1430 = vmatpush.msrb.mxu1 %v3117_v1  ;;  %v1270_v2 = vsel %vm188_vm2, %v2216_v58, %v2215_v59  ;;  %v1275_v49 = vsel %vm195_vm3, %v2220_v57, %v2221_v56  ;;  %v1269_v52 = vsel %vm188_vm2, %v2215_v59, %v2216_v58 }
 0xa53   : > { %v1277_v5 = vsel %vm2412_vm5, %v1270_v2, %v1275_v49  ;;  %v1276_v46 = vsel %vm195_vm3, %v2221_v56, %v2220_v57 }
 0xa54   : > { %1411 = vmatpush.msrb.mxu0 %v1277_v5  ;;  %v1278_v1 = vsel %vm2433_vm9, %v1269_v52, %v1276_v46 }
 0xa55   : > { %1431 = vmatpush.msrb.mxu1 %v1278_v1  ;;  %1709 = vmatmul.msk.f32.vlgmr.msrb.gmra.mxu0 %vm316_vm10, %v1708_v3 }
 0xa56   : > { %1710 = vmatmul.msk.f32.vlgmr.msrb.gmra.mxu1 %vm316_vm10, %v1708_v3 }
 0xad2   : > { %v1413_v6 = vpop.f32.mrf.mxu0 }
 0xad3   : > { %v1436_v51 = vadd.f32 %v2982_v60, %v1413_v6  ;;  %v1433_v50 = vpop.f32.mrf.mxu1 }
 0xad4   : > { %v1437_v7 = vadd.f32 %v2984_v63, %v1433_v50 }
 0xad5   : > { %2312 = vtanh.f32 %v1436_v51 }
 0xad6   : > { %2314 = vtanh.f32 %v1437_v7 }
 0xadb   : > { %v3218_v8 = vpop.eup %2312 }
 0xadc   : > { %v3220_v13 = vpop.eup %2314 }
 0xadd   : > { %v2242_v16 = vpack.i.bf16 %v3220_v13, %v3218_v8 }
 0xadf   : > { %2243 = vrot.lane.b32.xlu1 %v2242_v16, %s2325_s16  ;;  %2228 = vrot.lane.b32.xlu0 %v2242_v16, %s2327_s18 }
 0xae0   : > { %2223 = vrot.lane.b32.xlu2 %v2242_v16, %s2324_s15 }
 0xae7   : > { %2238 = vrot.lane.b32.xlu0 %v2242_v16, %s2326_s17 }
 0xae8   : > { %2233 = vrot.lane.b32.xlu2 %v2242_v16, %s2328_s19 }
 0xb3a   : > { %v2224_v60 = vpop.permute.xlu2 %2223 }
 0xb3b   : > { %v2226_v63 = vunpack.i.h.bf16 %v2224_v60  ;;  %v2225_v17 = vunpack.i.l.bf16 %v2224_v60 }
 0xb3d   : > { %v1518_v18 = vsel %vm260_vm0, %v2225_v17, %v2226_v63  ;;  %v1519_v19 = vsel %vm260_vm0, %v2226_v63, %v2225_v17 }
 0xb3e   : > { %v2262_v20 = vpack.i.bf16 %v1519_v19, %v1518_v18 }
 0xb40   : > { %2263 = vrot.lane.b32.xlu0 %v2262_v20, %s2325_s16  ;;  %2253 = vrot.lane.b32.xlu2 %v2262_v20, %s2326_s17 }
 0xb41   : > { %2248 = vrot.lane.b32.xlu1 %v2262_v20, %s2328_s19 }
 0xb42   : > { %v2234_v28 = vpop.permute.xlu2 %2233 }
 0xb43   : > { %v2236_v38 = vunpack.i.h.bf16 %v2234_v28  ;;  %v2235_v23 = vunpack.i.l.bf16 %v2234_v28 }
 0xb45   : > { %v1498_v46 = vsel %vm204_vm4, %v2235_v23, %v2236_v38  ;;  %v1499_v1 = vsel %vm204_vm4, %v2236_v38, %v2235_v23 }
 0xb48   : > { %2258 = vrot.lane.b32.xlu2 %v2242_v16, %s2329_s20 }
 0xb49   : > { %2268 = vrot.lane.b32.xlu1 %v2262_v20, %s2329_s20 }
 0xb51   : > { %v2229_v62 = vpop.permute.xlu0 %2228  ;;  %v2244_v31 = vpop.permute.xlu1 %2243 }
 0xb52   : > { %v2231_v61 = vunpack.i.h.bf16 %v2229_v62  ;;  %v2230_v21 = vunpack.i.l.bf16 %v2229_v62  ;;  %v2246_v3 = vunpack.i.h.bf16 %v2244_v31  ;;  %v2245_v5 = vunpack.i.l.bf16 %v2244_v31 }
 0xb54   : > { %v3240_v22 = vsel %vm181_vm1, %v2230_v21, %v2231_v61  ;;  %v3244_v25 = vsel %vm181_vm1, %v2231_v61, %v2230_v21  ;;  %v1485_v16 = vsel %vm188_vm2, %v2246_v3, %v2245_v5  ;;  %v1484_v60 = vsel %vm188_vm2, %v2245_v5, %v2246_v3 }
 0xb55   : > { %v2272_v27 = vpack.i.bf16 %v3240_v22, %v3244_v25 }
 0xb57   : > { %2273 = vrot.lane.b32.xlu0 %v2272_v27, %s2328_s19  ;;  %2283 = vrot.lane.b32.xlu2 %v2272_v27, %s2325_s16 }
 0xb58   : > { %2278 = vrot.lane.b32.xlu1 %v2272_v27, %s2326_s17 }
 0xb59   : > { %v2239_v32 = vpop.permute.xlu0 %2238 }
 0xb5a   : > { %v2241_v44 = vunpack.i.h.bf16 %v2239_v32  ;;  %v2240_v45 = vunpack.i.l.bf16 %v2239_v32 }
 0xb5c   : > { %v1505_v55 = vsel %vm211_vm6, %v2241_v44, %v2240_v45  ;;  %v1504_v56 = vsel %vm211_vm6, %v2240_v45, %v2241_v44 }
 0xb5d   : > { %v1506_v6 = vsel %vm2417_vm7, %v1498_v46, %v1505_v55  ;;  %v1507_v51 = vsel %vm2421_vm8, %v1499_v1, %v1504_v56 }
 0xb5f   : > { %2288 = vrot.lane.b32.xlu0 %v2272_v27, %s2329_s20 }
 0xb9a   : > { %v2254_v33 = vpop.permute.xlu2 %2253 }
 0xb9b   : > { %v2256_v34 = vunpack.i.h.bf16 %v2254_v33  ;;  %v2255_v35 = vunpack.i.l.bf16 %v2254_v33 }
 0xb9d   : > { %v1545_v14 = vsel %vm211_vm6, %v2256_v34, %v2255_v35  ;;  %v1544_v40 = vsel %vm211_vm6, %v2255_v35, %v2256_v34 }
 0xba2   : > { %v2259_v0 = vpop.permute.xlu2 %2258 }
 0xba3   : > { %v2261_v37 = vunpack.i.h.bf16 %v2259_v0  ;;  %v2260_v11 = vunpack.i.l.bf16 %v2259_v0 }
 0xba5   : > { %v1490_v50 = vsel %vm195_vm3, %v2260_v11, %v2261_v37  ;;  %v1491_v7 = vsel %vm195_vm3, %v2261_v37, %v2260_v11 }
 0xba6   : > { %v1492_v63 = vsel %vm2412_vm5, %v1485_v16, %v1490_v50  ;;  %v1493_v17 = vsel %vm2433_vm9, %v1484_v60, %v1491_v7 }
 0xbb1   : > { %v2284_v27 = vpop.permute.xlu2 %2283 }
 0xbb2   : > { %v2264_v41 = vpop.permute.xlu0 %2263  ;;  %v2286_v34 = vunpack.i.h.bf16 %v2284_v27  ;;  %v2285_v35 = vunpack.i.l.bf16 %v2284_v27 }
 0xbb3   : > { %v2249_v36 = vpop.permute.xlu1 %2248  ;;  %v2266_v48 = vunpack.i.h.bf16 %v2264_v41  ;;  %v2265_v53 = vunpack.i.l.bf16 %v2264_v41 }
 0xbb4   : > { %v2251_v9 = vunpack.i.h.bf16 %v2249_v36  ;;  %v2250_v12 = vunpack.i.l.bf16 %v2249_v36  ;;  %v1450_v30 = vsel %vm188_vm2, %v2285_v35, %v2286_v34 }
 0xbb5   : > { %v1525_v57 = vsel %vm188_vm2, %v2266_v48, %v2265_v53  ;;  %v1524_v59 = vsel %vm188_vm2, %v2265_v53, %v2266_v48 }
 0xbb6   : > { %v1538_v24 = vsel %vm204_vm4, %v2250_v12, %v2251_v9  ;;  %v1539_v39 = vsel %vm204_vm4, %v2251_v9, %v2250_v12 }
 0xbb7   : > { %v1546_v42 = vsel %vm2417_vm7, %v1538_v24, %v1545_v14  ;;  %v1547_v43 = vsel %vm2421_vm8, %v1539_v39, %v1544_v40  ;;  %v1451_v24 = vsel %vm188_vm2, %v2286_v34, %v2285_v35 }
 0xbb8   : > { %1584 = vmatpush.msrb.mxu2 %v1546_v42  ;;  %1604 = vmatpush.msrb.mxu3 %v1547_v43 }
 0xbba   : > { %1585 = vmatpush.msrb.mxu2 %v1518_v18  ;;  %1605 = vmatpush.msrb.mxu3 %v1519_v19 }
 0xbbb   : > { %v2269_v15 = vpop.permute.xlu1 %2268 }
 0xbbc   : > { %v2271_v10 = vunpack.i.h.bf16 %v2269_v15  ;;  %v2270_v54 = vunpack.i.l.bf16 %v2269_v15 }
 0xbbe   : > { %v1530_v58 = vsel %vm195_vm3, %v2270_v54, %v2271_v10  ;;  %v1531_v2 = vsel %vm195_vm3, %v2271_v10, %v2270_v54 }
 0xbbf   : > { %v1532_v49 = vsel %vm2412_vm5, %v1525_v57, %v1530_v58  ;;  %v1533_v52 = vsel %vm2433_vm9, %v1524_v59, %v1531_v2 }
 0xbc0   : > { %1586 = vmatpush.msrb.mxu2 %v1532_v49  ;;  %1606 = vmatpush.msrb.mxu3 %v1533_v52 }
 0xbc2   : > { %1587 = vmatpush.msrb.mxu2 %v1506_v6  ;;  %1607 = vmatpush.msrb.mxu3 %v1507_v51 }
 0xbc4   : > { %1588 = vmatpush.msrb.mxu2 %v3218_v8  ;;  %1608 = vmatpush.msrb.mxu3 %v3220_v13 }
 0xbc6   : > { %1589 = vmatpush.msrb.mxu2 %v1492_v63  ;;  %1609 = vmatpush.msrb.mxu3 %v1493_v17 }
 0xbc9   : > { %v2274_v18 = vpop.permute.xlu0 %2273 }
 0xbca   : > { %v2276_v19 = vunpack.i.h.bf16 %v2274_v18  ;;  %v2275_v20 = vunpack.i.l.bf16 %v2274_v18  ;;  %v2279_v8 = vpop.permute.xlu1 %2278 }
 0xbcb   : > { %v2281_v62 = vunpack.i.h.bf16 %v2279_v8  ;;  %v2280_v13 = vunpack.i.l.bf16 %v2279_v8 }
 0xbcc   : > { %v1464_v61 = vsel %vm204_vm4, %v2275_v20, %v2276_v19  ;;  %v1465_v21 = vsel %vm204_vm4, %v2276_v19, %v2275_v20 }
 0xbcd   : > { %v1471_v28 = vsel %vm211_vm6, %v2281_v62, %v2280_v13  ;;  %v1470_v31 = vsel %vm211_vm6, %v2280_v13, %v2281_v62 }
 0xbce   : > { %v1472_v32 = vsel %vm2417_vm7, %v1464_v61, %v1471_v28  ;;  %v1473_v33 = vsel %vm2421_vm8, %v1465_v21, %v1470_v31 }
 0xbcf   : > { %1590 = vmatpush.msrb.mxu2 %v1472_v32  ;;  %1610 = vmatpush.msrb.mxu3 %v1473_v33 }
 0xbd1   : > { %1591 = vmatpush.msrb.mxu2 %v3244_v25  ;;  %1611 = vmatpush.msrb.mxu3 %v3240_v22  ;;  %v2289_v36 = vpop.permute.xlu0 %2288  ;;  %v1711_v22 = vld [vmem:[%s3342_s1 + $0x38] sm:$0xff] }
 0xbd2   : > { %v2291_v9 = vunpack.i.h.bf16 %v2289_v36  ;;  %v2290_v12 = vunpack.i.l.bf16 %v2289_v36 }
 0xbd4   : > { %v1456_v29 = vsel %vm195_vm3, %v2290_v12, %v2291_v9  ;;  %v1457_v14 = vsel %vm195_vm3, %v2291_v9, %v2290_v12 }
 0xbd5   : > { %v1458_v25 = vsel %vm2412_vm5, %v1451_v24, %v1456_v29  ;;  %v1459_v39 = vsel %vm2433_vm9, %v1450_v30, %v1457_v14 }
 0xbd6   : > { %1592 = vmatpush.msrb.mxu2 %v1458_v25  ;;  %1612 = vmatpush.msrb.mxu3 %v1459_v39 }
 0xbd7   : > { %1712 = vmatmul.msk.f32.vlgmr.msrb.gmra.mxu2 %vm316_vm10, %v1711_v22  ;;  %1713 = vmatmul.msk.f32.vlgmr.msrb.gmra.mxu3 %vm316_vm10, %v1711_v22 }
 0xc5a   : > { %v1594_v40 = vpop.f32.mrf.mxu2  ;;  %v1614_v41 = vpop.f32.mrf.mxu3 }
 0xc5b   : > { %vm1617_vm11 = vcmp.ge.f32.partialorder %v1594_v40, 1.001  ;;  %vm1618_vm12 = vcmp.ge.f32.partialorder %v1614_v41, 1.001 }
 0xc5c   : > { %v1619_v4 = vsel %vm1617_vm11, 1.001, %v1594_v40  ;;  %v1620_v26 = vsel %vm1618_vm12, 1.001, %v1614_v41 }
 0xc5d   : > { %vm1621_vm13 = vcmp.le.f32.partialorder %v1619_v4, -1.001  ;;  %vm1622_vm14 = vcmp.le.f32.partialorder %v1620_v26, -1.001 }
 0xc5e   : > { %v1623_v47 = vsel %vm1621_vm13, -1.001, %v1619_v4  ;;  %v1624_v42 = vsel %vm1622_vm14, -1.001, %v1620_v26 }
 0xc5f   : > { %1625 = vst [vmem:[%s143_s14] sm:$0xff] %v1623_v47 }
 0xc60   : > { %1626 = vst [vmem:[%s143_s14 + $0x8] sm:$0xff] %v1624_v42 }
 0xc61 PF: > { %s12_s9 = sadd.s32 1, %s2322_s9  }
 0xc62   : > { %p9_p4 = scmp.ge.s32.totalorder %s12_s9, 4  }
 0xc64   :  { %11 = sbr.rel (!%p9_p4) target bundleno = 1 (0x1), region = 65 }

</bundles_post_ra>
